<compile_context>
chip_gen: v5e
topology: v5e:2x2
jax: 0.10.0
libtpu: 0.0.40
codegen_flags: <defaults>
</compile_context>

<pallas_src>
import functools

import jax
import jax.numpy as jnp
from jax.experimental import pallas as pl
from jax.experimental.pallas import tpu as pltpu

SEQ = 64
OUT = 32
NEG_SLOPE = 0.2  # the module calls F.leaky_relu(..., 0.2) explicitly


def _round_up(n, m):
    return ((n + m - 1) // m) * m


def _band_matrix(w, length):
    """(length, length) matrix M with M[i, j] = w[j - i + K//2] on the band.

    With x a length-SEQ column, `M @ x` is exactly the 'same'-padded
    1-channel cross-correlation torch.nn.Conv1d(1, 1, K, 1, K//2) computes
    (minus the bias, added separately).  Batch-major we use x_row @ M^T.
    """
    k = w.shape[0]
    pad = k // 2
    i = jnp.arange(length)[:, None]
    j = jnp.arange(length)[None, :]
    tap = j - i + pad
    valid = (tap >= 0) & (tap < k)
    return jnp.where(valid, w[jnp.clip(tap, 0, k - 1)], 0.0).astype(jnp.float32)


def _choose_tile(B, btile):
    """Pick the batch tile / padded batch.

    - batch sits on sublanes, so the tile only needs to be a multiple of 8;
      we keep it 128-aligned for clean DMA granularity.
    - big tiles amortize the ~0.35 us per-grid-step pipeline overhead
      (HBM-bound kernel), default 16384 ~= 12 MiB double-buffered x+out.
    - cap so the grid keeps >= 4 steps when B is large enough (v7x megacore
      sharding + real DMA/compute overlap).
    """
    align = 128
    btile = max(align, (btile // align) * align)
    bp_min = _round_up(B, align)
    four_steps = _round_up(pl.cdiv(bp_min, 4), align)
    bt = max(align, min(btile, four_steps))
    bp = _round_up(B, bt)
    return bt, bp


def _hash_kernel(b1_ref, b2_ref, x_ref, a1t_ref, a2t_ref, wlt_ref, bl_ref, o_ref):
    # x_ref  : (BT, SEQ)  f32 VMEM -- natural batch-major tile (no wrapper relayout)
    # a1t_ref: (SEQ, SEQ) f32 VMEM -- conv-1 band, transposed (grid-resident)
    # a2t_ref: (SEQ, SEQ) f32 VMEM -- conv-2 band, transposed (grid-resident)
    # wlt_ref: (SEQ, OUT) f32 VMEM -- Linear weight, transposed (grid-resident)
    # bl_ref : (1, OUT)   f32 VMEM -- Linear bias (grid-resident)
    # b1_ref, b2_ref: (1,) f32 SMEM -- conv biases
    # o_ref  : (BT, OUT)  f32 VMEM -- output tile (written in natural layout)
    hi = jax.lax.Precision.HIGHEST  # memory-bound: full-f32 MXU passes are free

    def lrelu(v):  # leaky_relu(v, 0.2); slope < 1 so max(v, 0.2*v) is exact
        return jnp.maximum(v, NEG_SLOPE * v)

    h = jnp.dot(x_ref[...], a1t_ref[...],
                preferred_element_type=jnp.float32, precision=hi)
    h = lrelu(h + b1_ref[0])
    h = jnp.dot(h, a2t_ref[...],
                preferred_element_type=jnp.float32, precision=hi)
    h = lrelu(h + b2_ref[0])
    logits = jnp.dot(h, wlt_ref[...],
                     preferred_element_type=jnp.float32, precision=hi)
    o_ref[...] = jnp.tanh(logits + bl_ref[...])


@functools.partial(jax.jit, static_argnames=("btile",))
def hash_func_forward(x, w1, b1, w2, b2, wl, bl, *, btile=16384):
    """x: (B, 1, 64) float32 (NCL, like the PyTorch module). Returns (B, 32)."""
    B = x.shape[0]
    x2d = x.reshape(B, SEQ).astype(jnp.float32)       # view, no copy

    bt, bp = _choose_tile(B, btile)
    # Pad only the batch remainder; no transpose.  When B % bt == 0 this is a
    # no-op (XLA elides the zero pad), so large aligned batches move exactly
    # the kernel's own bytes and nothing else.
    xp = x2d if bp == B else jnp.pad(x2d, ((0, bp - B), (0, 0)))

    a1t = _band_matrix(w1.astype(jnp.float32), SEQ).T  # (64, 64)
    a2t = _band_matrix(w2.astype(jnp.float32), SEQ).T  # (64, 64)
    wlt = wl.astype(jnp.float32).T                     # (64, 32)

    smem = pl.BlockSpec(memory_space=pltpu.MemorySpace.SMEM)
    resident = lambda shape: pl.BlockSpec(shape, lambda i: (0, 0))

    out = pl.pallas_call(
        _hash_kernel,
        out_shape=jax.ShapeDtypeStruct((bp, OUT), jnp.float32),
        grid=(bp // bt,),
        in_specs=[
            smem,                                        # b1 (scalar)
            smem,                                        # b2 (scalar)
            pl.BlockSpec((bt, SEQ), lambda i: (i, 0)),   # x, tiled on batch
            resident((SEQ, SEQ)),                        # a1^T (conv-1 band)
            resident((SEQ, SEQ)),                        # a2^T (conv-2 band)
            resident((SEQ, OUT)),                        # wl^T
            resident((1, OUT)),                          # bl
        ],
        out_specs=pl.BlockSpec((bt, OUT), lambda i: (i, 0)),
        compiler_params=pltpu.CompilerParams(
            dimension_semantics=("parallel",),
            # ~12 MiB live at bt=16384; 32 MiB is within scoped/physical VMEM
            # on v5e (128 MiB phys), v6e (128 MiB) and v7x (64 MiB phys).
            vmem_limit_bytes=32 * 1024 * 1024,
        ),
    )(
        b1.astype(jnp.float32),
        b2.astype(jnp.float32),
        xp,
        a1t,
        a2t,
        wlt,
        bl.reshape(1, OUT).astype(jnp.float32),
    )
    return out[:B]                                      # (B, 32); identity slice when B % bt == 0


def hash_func_reference(x, w1, b1, w2, b2, wl, bl):
    """Pure-JAX reference mirroring the PyTorch forward."""
    B = x.shape[0]
    h = x.reshape(B, SEQ).astype(jnp.float32)
    hp = jnp.pad(h, ((0, 0), (2, 2)))
    y = b1[0] + sum(w1[k] * hp[:, k:k + SEQ] for k in range(5))
    y = jnp.where(y > 0, y, NEG_SLOPE * y)
    yp = jnp.pad(y, ((0, 0), (1, 1)))
    y2 = b2[0] + sum(w2[k] * yp[:, k:k + SEQ] for k in range(3))
    y2 = jnp.where(y2 > 0, y2, NEG_SLOPE * y2)
    return jnp.tanh(y2 @ wl.T + bl)


if __name__ == "__main__":
    key = jax.random.PRNGKey(0)
    kx, k1, k2, k3, k4, k5, k6 = jax.random.split(key, 7)

    B = 8
    x = jax.random.normal(kx, (B, 1, SEQ), dtype=jnp.float32)

    # Deterministic synthetic parameters (shapes match the torch layers;
    # torch Conv1d weight (1,1,K) is stored here as (K,)).
    w1 = jax.random.uniform(k1, (5,), jnp.float32, -0.4, 0.4)            # l1.weight
    b1 = jax.random.uniform(k2, (1,), jnp.float32, -0.4, 0.4)            # l1.bias
    w2 = jax.random.uniform(k3, (3,), jnp.float32, -0.5, 0.5)            # l2.weight
    b2 = jax.random.uniform(k4, (1,), jnp.float32, -0.5, 0.5)            # l2.bias
    wl = jax.random.uniform(k5, (OUT, SEQ), jnp.float32, -0.125, 0.125)  # l3.weight
    bl = jax.random.uniform(k6, (OUT,), jnp.float32, -0.125, 0.125)      # l3.bias

    out = hash_func_forward(x, w1, b1, w2, b2, wl, bl)
    out = jax.block_until_ready(out)

    ref = hash_func_reference(x, w1, b1, w2, b2, wl, bl)
    assert out.shape == (B, OUT)
    assert jnp.allclose(out, ref, atol=1e-5, rtol=1e-5), "mismatch vs reference"

    print("KERNEL_OK")
</pallas_src>

<mosaic_0001>
module attributes {stable_mosaic.version = 11 : i64} {
  func.func @_hash_kernel(%arg0: i32, %arg1: memref<1xf32, #tpu.memory_space<smem>>, %arg2: memref<1xf32, #tpu.memory_space<smem>>, %arg3: memref<128x64xf32, #tpu.memory_space<vmem>>, %arg4: memref<64x64xf32, #tpu.memory_space<vmem>>, %arg5: memref<64x64xf32, #tpu.memory_space<vmem>>, %arg6: memref<64x32xf32, #tpu.memory_space<vmem>>, %arg7: memref<1x32xf32, #tpu.memory_space<vmem>>, %arg8: memref<128x32xf32, #tpu.memory_space<vmem>>) attributes {dimension_semantics = [#tpu.dimension_semantics<parallel>], iteration_bounds = array<i64: 1>, scalar_prefetch = 0 : i64, scratch_operands = 0 : i64, tpu.core_type = #tpu.core_type<tc>, window_params = [{transform_indices = @transform_0, window_bounds = array<i64: 1>}, {transform_indices = @transform_1, window_bounds = array<i64: 1>}, {transform_indices = @transform_2, window_bounds = array<i64: 128, 64>}, {pipeline_mode = #tpu.pipeline_mode<synchronous>, transform_indices = @transform_3, window_bounds = array<i64: 64, 64>}, {pipeline_mode = #tpu.pipeline_mode<synchronous>, transform_indices = @transform_4, window_bounds = array<i64: 64, 64>}, {pipeline_mode = #tpu.pipeline_mode<synchronous>, transform_indices = @transform_5, window_bounds = array<i64: 64, 32>}, {pipeline_mode = #tpu.pipeline_mode<synchronous>, transform_indices = @transform_6, window_bounds = array<i64: 1, 32>}, {transform_indices = @transform_7, window_bounds = array<i64: 128, 32>}]} {
    %c0 = arith.constant 0 : index
    %c0_0 = arith.constant 0 : index
    %0 = vector.load %arg3[%c0, %c0_0] : memref<128x64xf32, #tpu.memory_space<vmem>>, vector<128x64xf32>
    %c0_1 = arith.constant 0 : index
    %c0_2 = arith.constant 0 : index
    %1 = vector.load %arg4[%c0_1, %c0_2] : memref<64x64xf32, #tpu.memory_space<vmem>>, vector<64x64xf32>
    %cst = arith.constant dense<0.000000e+00> : vector<128x64xf32>
    %2 = tpu.matmul %0, %1, %cst {dimension_numbers = #tpu.dot_dimension_numbers<[1], [0], [0], [1], [0, 0, 1, 1], [], []>, precision = #tpu.contract_precision<fp32>} : vector<128x64xf32>, vector<64x64xf32>, vector<128x64xf32> -> vector<128x64xf32>
    %c0_3 = arith.constant 0 : index
    %3 = memref.load %arg1[%c0_3] : memref<1xf32, #tpu.memory_space<smem>>
    %4 = vector.broadcast %3 : f32 to vector<128x64xf32>
    %5 = arith.addf %2, %4 : vector<128x64xf32>
    %cst_4 = arith.constant 2.000000e-01 : f32
    %6 = vector.broadcast %cst_4 : f32 to vector<128x64xf32>
    %7 = arith.mulf %6, %5 : vector<128x64xf32>
    %8 = arith.maximumf %5, %7 : vector<128x64xf32>
    %c0_5 = arith.constant 0 : index
    %c0_6 = arith.constant 0 : index
    %9 = vector.load %arg5[%c0_5, %c0_6] : memref<64x64xf32, #tpu.memory_space<vmem>>, vector<64x64xf32>
    %cst_7 = arith.constant dense<0.000000e+00> : vector<128x64xf32>
    %10 = tpu.matmul %8, %9, %cst_7 {dimension_numbers = #tpu.dot_dimension_numbers<[1], [0], [0], [1], [0, 0, 1, 1], [], []>, precision = #tpu.contract_precision<fp32>} : vector<128x64xf32>, vector<64x64xf32>, vector<128x64xf32> -> vector<128x64xf32>
    %c0_8 = arith.constant 0 : index
    %11 = memref.load %arg2[%c0_8] : memref<1xf32, #tpu.memory_space<smem>>
    %12 = vector.broadcast %11 : f32 to vector<128x64xf32>
    %13 = arith.addf %10, %12 : vector<128x64xf32>
    %cst_9 = arith.constant 2.000000e-01 : f32
    %14 = vector.broadcast %cst_9 : f32 to vector<128x64xf32>
    %15 = arith.mulf %14, %13 : vector<128x64xf32>
    %16 = arith.maximumf %13, %15 : vector<128x64xf32>
    %c0_10 = arith.constant 0 : index
    %c0_11 = arith.constant 0 : index
    %17 = vector.load %arg6[%c0_10, %c0_11] : memref<64x32xf32, #tpu.memory_space<vmem>>, vector<64x32xf32>
    %cst_12 = arith.constant dense<0.000000e+00> : vector<128x32xf32>
    %18 = tpu.matmul %16, %17, %cst_12 {dimension_numbers = #tpu.dot_dimension_numbers<[1], [0], [0], [1], [0, 0, 1, 1], [], []>, precision = #tpu.contract_precision<fp32>} : vector<128x64xf32>, vector<64x32xf32>, vector<128x32xf32> -> vector<128x32xf32>
    %c0_13 = arith.constant 0 : index
    %c0_14 = arith.constant 0 : index
    %19 = vector.load %arg7[%c0_13, %c0_14] : memref<1x32xf32, #tpu.memory_space<vmem>>, vector<1x32xf32>
    %20 = vector.broadcast %19 : vector<1x32xf32> to vector<128x32xf32>
    %21 = arith.addf %18, %20 : vector<128x32xf32>
    %22 = math.tanh %21 : vector<128x32xf32>
    %c0_15 = arith.constant 0 : index
    %c0_16 = arith.constant 0 : index
    %23 = vector.load %arg8[%c0_15, %c0_16] : memref<128x32xf32, #tpu.memory_space<vmem>>, vector<128x32xf32>
    tpu.vector_store %arg8[%c0_15, %c0_16], %22 {strides = array<i32>} : memref<128x32xf32, #tpu.memory_space<vmem>>, vector<128x32xf32>,
    return
  }
  func.func @transform_0(%arg0: i32) -> i32 {
    %c0_i32 = arith.constant 0 : i32
    %c0_i32_0 = arith.constant 0 : i32
    return %c0_i32 : i32
  }
  func.func @transform_1(%arg0: i32) -> i32 {
    %c0_i32 = arith.constant 0 : i32
    %c0_i32_0 = arith.constant 0 : i32
    return %c0_i32 : i32
  }
  func.func @transform_2(%arg0: i32) -> (i32, i32) {
    %c0_i32 = arith.constant 0 : i32
    %c0_i32_0 = arith.constant 0 : i32
    return %arg0, %c0_i32 : i32, i32
  }
  func.func @transform_3(%arg0: i32) -> (i32, i32) {
    %c0_i32 = arith.constant 0 : i32
    %c0_i32_0 = arith.constant 0 : i32
    %c0_i32_1 = arith.constant 0 : i32
    return %c0_i32, %c0_i32_0 : i32, i32
  }
  func.func @transform_4(%arg0: i32) -> (i32, i32) {
    %c0_i32 = arith.constant 0 : i32
    %c0_i32_0 = arith.constant 0 : i32
    %c0_i32_1 = arith.constant 0 : i32
    return %c0_i32, %c0_i32_0 : i32, i32
  }
  func.func @transform_5(%arg0: i32) -> (i32, i32) {
    %c0_i32 = arith.constant 0 : i32
    %c0_i32_0 = arith.constant 0 : i32
    %c0_i32_1 = arith.constant 0 : i32
    return %c0_i32, %c0_i32_0 : i32, i32
  }
  func.func @transform_6(%arg0: i32) -> (i32, i32) {
    %c0_i32 = arith.constant 0 : i32
    %c0_i32_0 = arith.constant 0 : i32
    %c0_i32_1 = arith.constant 0 : i32
    return %c0_i32, %c0_i32_0 : i32, i32
  }
  func.func @transform_7(%arg0: i32) -> (i32, i32) {
    %c0_i32 = arith.constant 0 : i32
    %c0_i32_0 = arith.constant 0 : i32
    return %arg0, %c0_i32 : i32, i32
  }
}

</mosaic_0001>

<bundles_post_ra>
// kernel: hash_func_forward.1
= control target key start
LH: loop header
LB: loop body
LE: loop exit
PB: predicated region body
PF: predicated region fallthrough
CT: control target
= control target key end

     0   :  { %vm54_vm0 = vcmask 523264   ;;  %vm2407_vm1 = vcmask 261120   ;;  %s3789_s3 = inlined_call_operand.vmem [shape: f32[64,64], index: 3, kind: input, shape index: {}]   ;;  %s3790_s2 = inlined_call_operand.vmem [shape: f32[128,64], index: 2, kind: input, shape index: {}]   ;;  %s3791_s4 = inlined_call_operand.vmem [shape: f32[64,64], index: 4, kind: input, shape index: {}]   ;;  %s3792_s0 = inlined_call_operand.<no memory space> [shape: f32[1], index: 0, kind: input, shape index: {}]   ;;  %s3793_s5 = inlined_call_operand.vmem [shape: f32[64,32], index: 5, kind: input, shape index: {}]   ;;  %s3794_s1 = inlined_call_operand.<no memory space> [shape: f32[1], index: 1, kind: input, shape index: {}]   ;;  %s3795_s6 = inlined_call_operand.vmem [shape: f32[1,32], index: 6, kind: input, shape index: {}]   ;;  %s3796_s7 = inlined_call_operand.vmem [shape: f32[128,32], index: 7, kind: output, shape index: {}]  }
   0x1   :  { %v51_v0 = vld [vmem:[%s3789_s3 + $0x38] sm:$0xff]  ;;  %v50_v1 = vld [vmem:[%s3789_s3 + $0x30] sm:$0xff]  ;;  %v49_v2 = vld [vmem:[%s3789_s3 + $0x28] sm:$0xff] }
   0x2   :  { %v2526_v3 = vand.u32 4294901760, %v51_v0  ;;  %v2528_v4 = vand.u32 4294901760, %v50_v1  ;;  %v2530_v5 = vand.u32 4294901760, %v49_v2  ;;  %v48_v6 = vld [vmem:[%s3789_s3 + $0x20] sm:$0xff]  ;;  %v47_v7 = vld [vmem:[%s3789_s3 + $0x18] sm:$0xff]  ;;  %v46_v8 = vld [vmem:[%s3789_s3 + $0x10] sm:$0xff] }
   0x3   :  { %v2541_v9 = vand.u32 4294901760, %v48_v6  ;;  %v2543_v10 = vand.u32 4294901760, %v47_v7  ;;  %v2545_v11 = vand.u32 4294901760, %v46_v8  ;;  %v45_v12 = vld [vmem:[%s3789_s3 + $0x8] sm:$0xff]  ;;  %v44_v13 = vld [vmem:[%s3789_s3] sm:$0xff]  ;;  %v38_v45 = vld [vmem:[%s3790_s2 + $0x50] sm:$0xff] }
   0x4   :  { %v36_v14 = vld [vmem:[%s3790_s2 + $0x40] sm:$0xff]  ;;  %2428 = vmatpush.msra.mxu2 %v2526_v3  ;;  %v2558_v15 = vsub.f32 %v51_v0, %v2526_v3  ;;  %v2561_v16 = vsub.f32 %v50_v1, %v2528_v4  ;;  %v2563_v17 = vand.u32 4294901760, %v45_v12  ;;  %v2566_v18 = vsub.f32 %v49_v2, %v2530_v5  ;;  %112 = vmatpush.msra.mxu0 %v2526_v3  ;;  %v37_v37 = vld [vmem:[%s3790_s2 + $0x48] sm:$0xff]  ;;  %v30_v55 = vld [vmem:[%s3790_s2 + $0x10] sm:$0xff] }
   0x5   :  { %v2569_v19 = vand.u32 4294901760, %v44_v13  ;;  %v2572_v20 = vsub.f32 %v48_v6, %v2541_v9  ;;  %v80_v21 = vsel %vm54_vm0, %v36_v14, 0  ;;  %v2576_v22 = vsub.f32 %v47_v7, %v2543_v10  ;;  %v28_v38 = vld [vmem:[%s3790_s2] sm:$0xff]  ;;  %v29_v46 = vld [vmem:[%s3790_s2 + $0x8] sm:$0xff]  ;;  %v39_v0 = vld [vmem:[%s3790_s2 + $0x58] sm:$0xff] }
   0x6   :  { %2429 = vmatpush.msra.mxu2 %v2528_v4  ;;  %v266_v23 = vand.u32 4294901760, %v2558_v15  ;;  %v272_v24 = vand.u32 4294901760, %v2561_v16  ;;  %v278_v25 = vand.u32 4294901760, %v2566_v18  ;;  %v2582_v26 = vand.u32 4294901760, %v80_v21  ;;  %114 = vmatpush.msra.mxu0 %v2528_v4 }
   0x7   :  { %v284_v27 = vand.u32 4294901760, %v2572_v20  ;;  %v290_v28 = vand.u32 4294901760, %v2576_v22  ;;  %v2588_v29 = vsub.f32 %v46_v8, %v2545_v11  ;;  %v2591_v30 = vsub.f32 %v45_v12, %v2563_v17 }
   0x8   :  { %2430 = vmatpush.msra.mxu2 %v2530_v5  ;;  %v267_v31 = vsub.f32 %v2558_v15, %v266_v23  ;;  %v273_v32 = vsub.f32 %v2561_v16, %v272_v24  ;;  %v279_v33 = vsub.f32 %v2566_v18, %v278_v25  ;;  %v2604_v34 = vsub.f32 %v80_v21, %v2582_v26 }
   0x9   :  { %v285_v35 = vsub.f32 %v2572_v20, %v284_v27  ;;  %v296_v36 = vand.u32 4294901760, %v2588_v29  ;;  %116 = vmatpush.msra.mxu0 %v2530_v5  ;;  %v291_v43 = vsub.f32 %v2576_v22, %v290_v28  ;;  %v302_v44 = vand.u32 4294901760, %v2591_v30 }
   0xa   :  { %2431 = vmatpush.msra.mxu2 %v2541_v9  ;;  %v268_v39 = vand.u32 4294901760, %v267_v31  ;;  %v274_v40 = vand.u32 4294901760, %v273_v32  ;;  %v193_v41 = vand.u32 4294901760, %v2604_v34  ;;  %v280_v42 = vand.u32 4294901760, %v279_v33 }
   0xb   :  { %118 = vmatpush.msra.mxu0 %v2541_v9  ;;  %v2635_v48 = vsub.f32 %v44_v13, %v2569_v19  ;;  %v83_v49 = vsel %vm54_vm0, %v37_v37, 0  ;;  %v56_v50 = vsel %vm54_vm0, %v28_v38, 0  ;;  %v286_v51 = vand.u32 4294901760, %v285_v35 }
   0xc   :  { %2432 = vmatpush.msra.mxu2 %v2543_v10  ;;  %2436 = vmatpush.msra.mxu3 %v268_v39  ;;  %v194_v47 = vsub.f32 %v2604_v34, %v193_v41  ;;  %v297_v52 = vsub.f32 %v2588_v29, %v296_v36  ;;  %v2642_v53 = vand.u32 4294901760, %v83_v49  ;;  %v2645_v54 = vand.u32 4294901760, %v56_v50 }
   0xd   :  { %269 = vmatpush.msra.mxu1 %v268_v39  ;;  %120 = vmatpush.msra.mxu0 %v2543_v10  ;;  %v308_v57 = vand.u32 4294901760, %v2635_v48  ;;  %v86_v58 = vsel %vm54_vm0, %v38_v45, 0  ;;  %v59_v59 = vsel %vm54_vm0, %v29_v46, 0  ;;  %v292_v1 = vand.u32 4294901760, %v291_v43 }
   0xe   :  { %2433 = vmatpush.msra.mxu2 %v2545_v11  ;;  %2437 = vmatpush.msra.mxu3 %v274_v40  ;;  %v195_v56 = vand.u32 4294901760, %v194_v47  ;;  %v2655_v60 = vsub.f32 %v83_v49, %v2642_v53  ;;  %v2659_v61 = vsub.f32 %v56_v50, %v2645_v54  ;;  %v2661_v62 = vand.u32 4294901760, %v86_v58  ;;  %v40_v50 = vld [vmem:[%s3790_s2 + $0x60] sm:$0xff] }
   0xf   :  { %275 = vmatpush.msra.mxu1 %v274_v40  ;;  %122 = vmatpush.msra.mxu0 %v2545_v11  ;;  %v2663_v63 = vand.u32 4294901760, %v59_v59  ;;  %v303_v2 = vsub.f32 %v2591_v30, %v302_v44  ;;  %v62_v6 = vsel %vm54_vm0, %v30_v55, 0  ;;  %v298_v13 = vand.u32 4294901760, %v297_v52  ;;  %v31_v40 = vld [vmem:[%s3790_s2 + $0x18] sm:$0xff] }
  0x10   :  { %2434 = vmatpush.msra.mxu2 %v2563_v17  ;;  %2438 = vmatpush.msra.mxu3 %v280_v42  ;;  %v201_v7 = vand.u32 4294901760, %v2655_v60  ;;  %v129_v8 = vand.u32 4294901760, %v2659_v61  ;;  %v309_v14 = vsub.f32 %v2635_v48, %v308_v57  ;;  %v2684_v21 = vsub.f32 %v86_v58, %v2661_v62 }
  0x11   :  { %281 = vmatpush.msra.mxu1 %v280_v42  ;;  %124 = vmatpush.msra.mxu0 %v2563_v17  ;;  %v2677_v12 = vsub.f32 %v59_v59, %v2663_v63  ;;  %v89_v31 = vsel %vm54_vm0, %v39_v0, 0  ;;  %v2694_v37 = vand.u32 4294901760, %v62_v6  ;;  %v304_v38 = vand.u32 4294901760, %v303_v2 }
  0x12   :  { %2435 = vmatpush.msra.mxu2 %v2569_v19  ;;  %2439 = vmatpush.msra.mxu3 %v286_v51  ;;  %v202_v32 = vsub.f32 %v2655_v60, %v201_v7  ;;  %v130_v33 = vsub.f32 %v2659_v61, %v129_v8  ;;  %v310_v42 = vand.u32 4294901760, %v309_v14  ;;  %v2702_v43 = vand.u32 4294901760, %v89_v31 }
  0x13   :  { %196 = vmatmul.f32.vlgmr.msra.gmra.mxu2 %v195_v56  ;;  %287 = vmatpush.msra.mxu1 %v286_v51  ;;  %v137_v35 = vand.u32 4294901760, %v2677_v12  ;;  %v209_v46 = vand.u32 4294901760, %v2684_v21  ;;  %v2709_v49 = vsub.f32 %v62_v6, %v2694_v37  ;;  %v65_v51 = vsel %vm54_vm0, %v31_v40, 0  ;;  %v41_v6 = vld [vmem:[%s3790_s2 + $0x68] sm:$0xff] }
  0x14   :  { %2440 = vmatpush.msra.mxu3 %v292_v1  ;;  %387 = vmatpush.msrb.mxu2 %v2558_v15  ;;  %v131_v39 = vand.u32 4294901760, %v130_v33  ;;  %v203_v45 = vand.u32 4294901760, %v202_v32  ;;  %v2719_v52 = vsub.f32 %v89_v31, %v2702_v43  ;;  %v92_v55 = vsel %vm54_vm0, %v40_v50, 0 }
  0x15   :  { %293 = vmatpush.msra.mxu1 %v292_v1  ;;  %126 = vmatpush.msra.mxu0 %v2569_v19  ;;  %v138_v47 = vsub.f32 %v2677_v12, %v137_v35  ;;  %v210_v15 = vsub.f32 %v2684_v21, %v209_v46  ;;  %v145_v56 = vand.u32 4294901760, %v2709_v49  ;;  %v2729_v58 = vand.u32 4294901760, %v65_v51 }
  0x16   :  { %2441 = vmatpush.msra.mxu3 %v298_v13  ;;  %390 = vmatpush.msrb.mxu2 %v2561_v16  ;;  %v32_v16 = vld [vmem:[%s3790_s2 + $0x20] sm:$0xff]  ;;  %v217_v0 = vand.u32 4294901760, %v2719_v52  ;;  %v95_v31 = vsel %vm54_vm0, %v41_v6, 0 }
  0x17   :  { %299 = vmatpush.msra.mxu1 %v298_v13  ;;  %132 = vmatmul.f32.vlgmr.msra.gmra.mxu0 %v131_v39  ;;  %v211_v59 = vand.u32 4294901760, %v210_v15  ;;  %v146_v1 = vsub.f32 %v2709_v49, %v145_v56  ;;  %v2747_v2 = vsub.f32 %v65_v51, %v2729_v58  ;;  %v42_v39 = vld [vmem:[%s3790_s2 + $0x70] sm:$0xff] }
  0x18   :  { %2442 = vmatpush.msra.mxu3 %v304_v38  ;;  %622 = vmatpush.msrb.mxu0 %v266_v23  ;;  %v139_v23 = vand.u32 4294901760, %v138_v47 }
  0x19   :  { %305 = vmatpush.msra.mxu1 %v304_v38  ;;  %393 = vmatpush.msrb.mxu2 %v2566_v18  ;;  %v147_v18 = vand.u32 4294901760, %v146_v1 }
  0x1a   :  { %2443 = vmatpush.msra.mxu3 %v310_v42  ;;  %626 = vmatpush.msrb.mxu0 %v272_v24  ;;  %v2739_v24 = vand.u32 4294901760, %v92_v55 }
  0x1b   :  { %204 = vmatmul.f32.gmra.mxu2 %v203_v45  ;;  %345 = vmatmul.f32.vlgmr.msra.gmra.mxu3 %v2582_v26 }
  0x1c   :  { %499 = vmatpush.msrb.mxu3 %v2526_v3  ;;  %311 = vmatpush.msra.mxu1 %v310_v42  ;;  %v2759_v13 = vsub.f32 %v92_v55, %v2739_v24  ;;  %v98_v42 = vsel %vm54_vm0, %v42_v39, 0 }
  0x1d   :  { %313 = vmatmul.f32.vlgmr.msra.gmra.mxu1 %v2645_v54  ;;  %396 = vmatpush.msrb.mxu2 %v2572_v20 }
  0x1e   :  { %501 = vmatpush.msrb.mxu3 %v2528_v4  ;;  %725 = vmatpush.msrb.mxu1 %v2526_v3  ;;  %v68_v3 = vsel %vm54_vm0, %v32_v16, 0  ;;  %v225_v32 = vand.u32 4294901760, %v2759_v13 }
  0x1f   :  { %140 = vmatmul.f32.gmra.mxu0 %v139_v23  ;;  %399 = vmatpush.msrb.mxu2 %v2576_v22  ;;  %v2768_v14 = vand.u32 4294901760, %v68_v3  ;;  %v35_v23 = vld [vmem:[%s3790_s2 + $0x38] sm:$0xff] }
  0x20   :  { %503 = vmatpush.msrb.mxu3 %v2530_v5  ;;  %727 = vmatpush.msrb.mxu1 %v2528_v4  ;;  %v218_v4 = vsub.f32 %v2719_v52, %v217_v0  ;;  %v226_v40 = vsub.f32 %v2759_v13, %v225_v32 }
  0x21   :  { %630 = vmatpush.msrb.mxu0 %v278_v25  ;;  %402 = vmatpush.msrb.mxu2 %v2588_v29  ;;  %v153_v25 = vand.u32 4294901760, %v2747_v2  ;;  %v2788_v38 = vsub.f32 %v68_v3, %v2768_v14  ;;  %v2820_v29 = vand.u32 4294901760, %v98_v42 }
  0x22   :  { %505 = vmatpush.msrb.mxu3 %v2541_v9  ;;  %729 = vmatpush.msrb.mxu1 %v2530_v5  ;;  %v33_v5 = vld [vmem:[%s3790_s2 + $0x28] sm:$0xff]  ;;  %v219_v33 = vand.u32 4294901760, %v218_v4  ;;  %v77_v4 = vsel %vm54_vm0, %v35_v23, 0 }
  0x23   :  { %212 = vmatmul.f32.gmra.mxu2 %v211_v59  ;;  %349 = vmatmul.f32.gmra.mxu3 %v2642_v53  ;;  %v154_v20 = vsub.f32 %v2747_v2, %v153_v25 }
  0x24   :  { %507 = vmatpush.msrb.mxu3 %v2543_v10  ;;  %634 = vmatpush.msrb.mxu0 %v284_v27  ;;  %v2785_v27 = vand.u32 4294901760, %v95_v31 }
  0x25   :  { %317 = vmatmul.f32.gmra.mxu1 %v2663_v63  ;;  %405 = vmatpush.msrb.mxu2 %v2591_v30  ;;  %v155_v22 = vand.u32 4294901760, %v154_v20  ;;  %v2870_v20 = vand.u32 4294901760, %v77_v4 }
  0x26   :  { %731 = vmatpush.msrb.mxu1 %v2541_v9  ;;  %509 = vmatpush.msrb.mxu3 %v2545_v11  ;;  %v71_v9 = vsel %vm54_vm0, %v33_v5, 0 }
  0x27   :  { %148 = vmatmul.f32.gmra.mxu0 %v147_v18  ;;  %408 = vmatpush.msrb.mxu2 %v2635_v48  ;;  %v2811_v45 = vand.u32 4294901760, %v71_v9  ;;  %v2838_v48 = vsub.f32 %v98_v42, %v2820_v29  ;;  %v2878_v42 = vsub.f32 %v77_v4, %v2870_v20  ;;  %v843_v4 = vld [vmem:[%s3791_s4 + $0x30] sm:$0xff] }
  0x28   :  { %638 = vmatpush.msrb.mxu0 %v290_v28  ;;  %733 = vmatpush.msrb.mxu1 %v2543_v10  ;;  %v2808_v10 = vsub.f32 %v95_v31, %v2785_v27  ;;  %v161_v28 = vand.u32 4294901760, %v2788_v38 }
  0x29   :  { %511 = vmatpush.msrb.mxu3 %v2563_v17  ;;  %v241_v16 = vand.u32 4294901760, %v2838_v48 }
  0x2a   :  { %642 = vmatpush.msrb.mxu0 %v296_v36  ;;  %735 = vmatpush.msrb.mxu1 %v2545_v11  ;;  %v34_v11 = vld [vmem:[%s3790_s2 + $0x30] sm:$0xff]  ;;  %v227_v36 = vand.u32 4294901760, %v226_v40  ;;  %v233_v47 = vand.u32 4294901760, %v2808_v10  ;;  %v162_v30 = vsub.f32 %v2788_v38, %v161_v28 }
  0x2b   :  { %220 = vmatmul.f32.gmra.mxu2 %v219_v33  ;;  %353 = vmatmul.f32.gmra.mxu3 %v2661_v62  ;;  %v74_v50 = vsel %vm54_vm0, %v34_v11, 0  ;;  %v242_v18 = vsub.f32 %v2838_v48, %v241_v16 }
  0x2c   :  { %513 = vmatpush.msrb.mxu3 %v2569_v19  ;;  %646 = vmatpush.msrb.mxu0 %v302_v44  ;;  %v2830_v44 = vsub.f32 %v71_v9, %v2811_v45  ;;  %v163_v51 = vand.u32 4294901760, %v162_v30  ;;  %v2845_v15 = vand.u32 4294901760, %v74_v50 }
  0x2d   :  { %321 = vmatmul.f32.gmra.mxu1 %v2694_v37  ;;  %v243_v39 = vand.u32 4294901760, %v242_v18  ;;  %v2921_v18 = vand.u32 4294901760, %v843_v4 }
  0x2e   :  { %737 = vmatpush.msrb.mxu1 %v2563_v17  ;;  %650 = vmatpush.msrb.mxu0 %v308_v57  ;;  %v43_v17 = vld [vmem:[%s3790_s2 + $0x78] sm:$0xff]  ;;  %v234_v57 = vsub.f32 %v2808_v10, %v233_v47  ;;  %v169_v55 = vand.u32 4294901760, %v2830_v44  ;;  %v2859_v6 = vsub.f32 %v74_v50, %v2845_v15 }
  0x2f   :  { %156 = vmatmul.f32.gmra.mxu0 %v155_v22 }
  0x30   :  { %739 = vmatpush.msrb.mxu1 %v2569_v19  ;;  %v101_v19 = vsel %vm54_vm0, %v43_v17, 0  ;;  %v235_v59 = vand.u32 4294901760, %v234_v57  ;;  %v170_v1 = vsub.f32 %v2830_v44, %v169_v55  ;;  %v177_v33 = vand.u32 4294901760, %v2859_v6  ;;  %v844_v57 = vld [vmem:[%s3791_s4 + $0x38] sm:$0xff] }
  0x31   :  { %v2856_v3 = vand.u32 4294901760, %v101_v19 }
  0x32   :  { %v171_v31 = vand.u32 4294901760, %v170_v1  ;;  %v178_v40 = vsub.f32 %v2859_v6, %v177_v33 }
  0x33   :  { %228 = vmatmul.f32.gmra.mxu2 %v227_v36  ;;  %357 = vmatmul.f32.gmra.mxu3 %v2702_v43  ;;  %v2867_v5 = vsub.f32 %v101_v19, %v2856_v3  ;;  %v185_v36 = vand.u32 4294901760, %v2878_v42 }
  0x34   :  { %v179_v11 = vand.u32 4294901760, %v178_v40 }
  0x35   :  { %325 = vmatmul.f32.gmra.mxu1 %v2729_v58  ;;  %v249_v9 = vand.u32 4294901760, %v2867_v5  ;;  %v186_v50 = vsub.f32 %v2878_v42, %v185_v36 }
  0x37   :  { %164 = vmatmul.f32.gmra.mxu0 %v163_v51  ;;  %v250_v22 = vsub.f32 %v2867_v5, %v249_v9  ;;  %v187_v17 = vand.u32 4294901760, %v186_v50  ;;  %v2896_v51 = vand.u32 4294901760, %v844_v57 }
  0x39   :  { %v251_v30 = vand.u32 4294901760, %v250_v22  ;;  %904 = vmatpush.msra.mxu2 %v2896_v51  ;;  %v2901_v19 = vsub.f32 %v844_v57, %v2896_v51  ;;  %1291 = vmatpush.msra.mxu1 %v2896_v51 }
  0x3b   :  { %236 = vmatmul.f32.gmra.mxu2 %v235_v59  ;;  %361 = vmatmul.f32.gmra.mxu3 %v2739_v24  ;;  %v1058_v23 = vand.u32 4294901760, %v2901_v19 }
  0x3c   :  { %1179 = vmatpush.msra.mxu0 %v2901_v19  ;;  %906 = vmatpush.msra.mxu2 %v2921_v18 }
  0x3d   :  { %329 = vmatmul.f32.gmra.mxu1 %v2768_v14  ;;  %v1059_v59 = vsub.f32 %v2901_v19, %v1058_v23 }
  0x3e   :  { %1293 = vmatpush.msra.mxu1 %v2921_v18 }
  0x3f   :  { %172 = vmatmul.f32.gmra.mxu0 %v171_v31  ;;  %v1060_v1 = vand.u32 4294901760, %v1059_v59 }
  0x41   :  { %1061 = vmatpush.msra.mxu3 %v1060_v1 }
  0x43   :  { %244 = vmatmul.f32.gmra.mxu2 %v243_v39  ;;  %365 = vmatmul.f32.gmra.mxu3 %v2785_v27 }
  0x45   :  { %333 = vmatmul.f32.gmra.mxu1 %v2811_v45 }
  0x47   :  { %180 = vmatmul.f32.gmra.mxu0 %v179_v11 }
  0x4b   :  { %252 = vmatmul.f32.gmra.mxu2 %v251_v30  ;;  %369 = vmatmul.f32.gmra.mxu3 %v2820_v29 }
  0x4d   :  { %337 = vmatmul.f32.gmra.mxu1 %v2845_v15 }
  0x4f   :  { %188 = vmatmul.f32.gmra.mxu0 %v187_v17 }
  0x53   :  { %373 = vmatmul.f32.gmra.mxu3 %v2856_v3  ;;  %411 = vmatmul.f32.vlgmr.msrb.gmra.mxu2 %v2659_v61 }
  0x55   :  { %341 = vmatmul.f32.gmra.mxu1 %v2870_v20 }
  0x57   :  { %652 = vmatmul.f32.vlgmr.msrb.gmra.mxu0 %v2645_v54 }
  0x5b   :  { %416 = vmatmul.f32.gmra.mxu2 %v2677_v12  ;;  %517 = vmatmul.f32.vlgmr.msrb.gmra.mxu3 %v129_v8  ;;  %v842_v12 = vld [vmem:[%s3791_s4 + $0x28] sm:$0xff] }
  0x5d   :  { %741 = vmatmul.f32.vlgmr.msrb.gmra.mxu1 %v2645_v54  ;;  %v2926_v54 = vsub.f32 %v843_v4, %v2921_v18 }
  0x5f   :  { %656 = vmatmul.f32.gmra.mxu0 %v2663_v63  ;;  %v1064_v61 = vand.u32 4294901760, %v2926_v54 }
  0x60   :  { %1182 = vmatpush.msra.mxu0 %v2926_v54 }
  0x61   :  { %v1065_v8 = vsub.f32 %v2926_v54, %v1064_v61 }
  0x63   :  { %421 = vmatmul.f32.gmra.mxu2 %v2709_v49  ;;  %523 = vmatmul.f32.gmra.mxu3 %v137_v35  ;;  %v2946_v35 = vand.u32 4294901760, %v842_v12 }
  0x65   :  { %745 = vmatmul.f32.gmra.mxu1 %v2663_v63  ;;  %v1066_v63 = vand.u32 4294901760, %v1065_v8  ;;  %908 = vmatpush.msra.mxu2 %v2946_v35 }
  0x66   :  { %1295 = vmatpush.msra.mxu1 %v2946_v35 }
  0x67   :  { %660 = vmatmul.f32.gmra.mxu0 %v2694_v37  ;;  %1067 = vmatpush.msra.mxu3 %v1066_v63 }
  0x6b   :  { %426 = vmatmul.f32.gmra.mxu2 %v2747_v2  ;;  %529 = vmatmul.f32.gmra.mxu3 %v145_v56  ;;  %v841_v2 = vld [vmem:[%s3791_s4 + $0x20] sm:$0xff] }
  0x6d   :  { %749 = vmatmul.f32.gmra.mxu1 %v2694_v37  ;;  %v2953_v37 = vsub.f32 %v842_v12, %v2946_v35 }
  0x6f   :  { %664 = vmatmul.f32.gmra.mxu0 %v2729_v58  ;;  %v1070_v49 = vand.u32 4294901760, %v2953_v37 }
  0x70   :  { %1185 = vmatpush.msra.mxu0 %v2953_v37 }
  0x71   :  { %v1071_v56 = vsub.f32 %v2953_v37, %v1070_v49 }
  0x73   :  { %431 = vmatmul.f32.gmra.mxu2 %v2788_v38  ;;  %535 = vmatmul.f32.gmra.mxu3 %v153_v25  ;;  %v2971_v25 = vand.u32 4294901760, %v841_v2 }
  0x75   :  { %753 = vmatmul.f32.gmra.mxu1 %v2729_v58  ;;  %v1072_v58 = vand.u32 4294901760, %v1071_v56  ;;  %910 = vmatpush.msra.mxu2 %v2971_v25 }
  0x76   :  { %1297 = vmatpush.msra.mxu1 %v2971_v25 }
  0x77   :  { %668 = vmatmul.f32.gmra.mxu0 %v2768_v14  ;;  %1073 = vmatpush.msra.mxu3 %v1072_v58 }
  0x7b   :  { %436 = vmatmul.f32.gmra.mxu2 %v2830_v44  ;;  %541 = vmatmul.f32.gmra.mxu3 %v161_v28  ;;  %v840_v44 = vld [vmem:[%s3791_s4 + $0x18] sm:$0xff] }
  0x7d   :  { %757 = vmatmul.f32.gmra.mxu1 %v2768_v14  ;;  %v2978_v14 = vsub.f32 %v841_v2, %v2971_v25 }
  0x7f   :  { %672 = vmatmul.f32.gmra.mxu0 %v2811_v45  ;;  %v1076_v38 = vand.u32 4294901760, %v2978_v14 }
  0x80   :  { %1188 = vmatpush.msra.mxu0 %v2978_v14 }
  0x81   :  { %v1077_v28 = vsub.f32 %v2978_v14, %v1076_v38 }
  0x83   :  { %441 = vmatmul.f32.gmra.mxu2 %v2859_v6  ;;  %547 = vmatmul.f32.gmra.mxu3 %v169_v55  ;;  %v2998_v6 = vand.u32 4294901760, %v840_v44 }
  0x85   :  { %761 = vmatmul.f32.gmra.mxu1 %v2811_v45  ;;  %v1078_v45 = vand.u32 4294901760, %v1077_v28  ;;  %912 = vmatpush.msra.mxu2 %v2998_v6  ;;  %v3007_v31 = vsub.f32 %v840_v44, %v2998_v6  ;;  %v837_v44 = vld [vmem:[%s3791_s4] sm:$0xff] }
  0x86   :  { %1299 = vmatpush.msra.mxu1 %v2998_v6 }
  0x87   :  { %676 = vmatmul.f32.gmra.mxu0 %v2845_v15  ;;  %1079 = vmatpush.msra.mxu3 %v1078_v45 }
  0x88   :  { %1191 = vmatpush.msra.mxu0 %v3007_v31 }
  0x8b   :  { %446 = vmatmul.f32.gmra.mxu2 %v2878_v42  ;;  %553 = vmatmul.f32.gmra.mxu3 %v177_v33  ;;  %v1082_v33 = vand.u32 4294901760, %v3007_v31 }
  0x8d   :  { %765 = vmatmul.f32.gmra.mxu1 %v2845_v15 }
  0x8f   :  { %680 = vmatmul.f32.gmra.mxu0 %v2870_v20 }
  0x93   :  { %451 = vmatmul.f32.gmra.mxu2 %v2604_v34  ;;  %559 = vmatmul.f32.gmra.mxu3 %v185_v36  ;;  %v839_v34 = vld [vmem:[%s3791_s4 + $0x10] sm:$0xff] }
  0x94   :  { %v2996_v55 = vpop.f32.mrf.mxu0 }
  0x95   :  { %769 = vmatmul.f32.gmra.mxu1 %v2870_v20  ;;  %v1083_v20 = vsub.f32 %v3007_v31, %v1082_v33 }
  0x96   :  { %v3001_v15 = vpop.f32.mrf.mxu2 }
  0x97   :  { %684 = vmatmul.f32.gmra.mxu0 %v2582_v26  ;;  %v1084_v42 = vand.u32 4294901760, %v1083_v20  ;;  %v917_v20 = vand.u32 4294901760, %v837_v44 }
  0x99   :  { %1085 = vmatpush.msra.mxu3 %v1084_v42 }
  0x9a   :  { %v3011_v39 = vpop.f32.mrf.mxu1 }
  0x9b   :  { %456 = vmatmul.f32.gmra.mxu2 %v2655_v60  ;;  %565 = vmatmul.f32.gmra.mxu3 %v193_v41  ;;  %v3037_v41 = vand.u32 4294901760, %v839_v34 }
  0x9c   :  { %v3019_v40 = vpop.f32.mrf.mxu0 }
  0x9d   :  { %773 = vmatmul.f32.gmra.mxu1 %v2582_v26  ;;  %914 = vmatpush.msra.mxu2 %v3037_v41  ;;  %v3048_v60 = vsub.f32 %v839_v34, %v3037_v41 }
  0x9e   :  { %v3022_v22 = vpop.f32.mrf.mxu2  ;;  %v3024_v11 = vpop.f32.mrf.mxu3  ;;  %1301 = vmatpush.msra.mxu1 %v3037_v41 }
  0x9f   :  { %688 = vmatmul.f32.gmra.mxu0 %v2642_v53 }
  0xa0   :  { %1194 = vmatpush.msra.mxu0 %v3048_v60 }
  0xa2   :  { %v3027_v36 = vpop.f32.mrf.mxu1 }
  0xa3   :  { %461 = vmatmul.f32.gmra.mxu2 %v2684_v21  ;;  %571 = vmatmul.f32.gmra.mxu3 %v201_v7  ;;  %v1088_v7 = vand.u32 4294901760, %v3048_v60  ;;  %v838_v21 = vld [vmem:[%s3791_s4 + $0x8] sm:$0xff] }
  0xa4   :  { %v3035_v26 = vpop.f32.mrf.mxu0 }
  0xa5   :  { %777 = vmatmul.f32.gmra.mxu1 %v2642_v53  ;;  %v1089_v53 = vsub.f32 %v3048_v60, %v1088_v7 }
  0xa6   :  { %v3040_v30 = vpop.f32.mrf.mxu2  ;;  %v3042_v50 = vpop.f32.mrf.mxu3 }
  0xa7   :  { %692 = vmatmul.f32.gmra.mxu0 %v2661_v62  ;;  %v1090_v59 = vand.u32 4294901760, %v1089_v53 }
  0xa9   :  { %1091 = vmatpush.msra.mxu3 %v1090_v59 }
  0xaa   :  { %v3052_v17 = vpop.f32.mrf.mxu1 }
  0xab   :  { %466 = vmatmul.f32.gmra.mxu2 %v2719_v52  ;;  %577 = vmatmul.f32.gmra.mxu3 %v209_v46  ;;  %v3078_v46 = vand.u32 4294901760, %v838_v21 }
  0xac   :  { %v3060_v57 = vpop.f32.mrf.mxu0 }
  0xad   :  { %781 = vmatmul.f32.gmra.mxu1 %v2661_v62  ;;  %916 = vmatpush.msra.mxu2 %v3078_v46  ;;  %v1093_v52 = vsub.f32 %v838_v21, %v3078_v46 }
  0xae   :  { %v3063_v1 = vpop.f32.mrf.mxu2  ;;  %v3065_v4 = vpop.f32.mrf.mxu3  ;;  %1303 = vmatpush.msra.mxu1 %v3078_v46 }
  0xaf   :  { %696 = vmatmul.f32.gmra.mxu0 %v2702_v43  ;;  %918 = vmatpush.msra.mxu2 %v917_v20 }
  0xb0   :  { %1197 = vmatpush.msra.mxu0 %v1093_v52  ;;  %1305 = vmatpush.msra.mxu1 %v917_v20 }
  0xb1   :  { %1414 = vmatpush.msrb.mxu2 %v1058_v23 }
  0xb2   :  { %v3068_v8 = vpop.f32.mrf.mxu1 }
  0xb3   :  { %471 = vmatmul.f32.gmra.mxu2 %v2759_v13  ;;  %583 = vmatmul.f32.gmra.mxu3 %v217_v0  ;;  %v1094_v0 = vand.u32 4294901760, %v1093_v52 }
  0xb4   :  { %v3076_v62 = vpop.f32.mrf.mxu0  ;;  %1418 = vmatpush.msrb.mxu2 %v1064_v61 }
  0xb5   :  { %785 = vmatmul.f32.gmra.mxu1 %v2702_v43  ;;  %v1095_v43 = vsub.f32 %v1093_v52, %v1094_v0 }
  0xb6   :  { %v3081_v63 = vpop.f32.mrf.mxu2  ;;  %v3083_v12 = vpop.f32.mrf.mxu3  ;;  %1422 = vmatpush.msrb.mxu2 %v1070_v49 }
  0xb7   :  { %700 = vmatmul.f32.gmra.mxu0 %v2739_v24  ;;  %v1096_v2 = vand.u32 4294901760, %v1095_v43 }
  0xb8   :  { %1426 = vmatpush.msrb.mxu2 %v1076_v38 }
  0xb9   :  { %1097 = vmatpush.msra.mxu3 %v1096_v2 }
  0xba   :  { %v3089_v56 = vpop.f32.mrf.mxu1  ;;  %1430 = vmatpush.msrb.mxu2 %v1082_v33 }
  0xbb   :  { %476 = vmatmul.f32.gmra.mxu2 %v2808_v10  ;;  %589 = vmatmul.f32.gmra.mxu3 %v225_v32 }
  0xbc   :  { %v3094_v58 = vpop.f32.mrf.mxu0  ;;  %1434 = vmatpush.msrb.mxu2 %v1088_v7 }
  0xbd   :  { %789 = vmatmul.f32.gmra.mxu1 %v2739_v24  ;;  %v1099_v24 = vsub.f32 %v837_v44, %v917_v20 }
  0xbe   :  { %v3097_v28 = vpop.f32.mrf.mxu2  ;;  %v3099_v45 = vpop.f32.mrf.mxu3  ;;  %1438 = vmatpush.msrb.mxu2 %v1094_v0 }
  0xbf   :  { %704 = vmatmul.f32.gmra.mxu0 %v2785_v27  ;;  %v1100_v42 = vand.u32 4294901760, %v1099_v24 }
  0xc0   :  { %1200 = vmatpush.msra.mxu0 %v1099_v24 }
  0xc1   :  { %v1101_v10 = vsub.f32 %v1099_v24, %v1100_v42  ;;  %1442 = vmatpush.msrb.mxu2 %v1100_v42 }
  0xc2   :  { %v3105_v13 = vpop.f32.mrf.mxu1 }
  0xc3   :  { %481 = vmatmul.f32.gmra.mxu2 %v2838_v48  ;;  %595 = vmatmul.f32.gmra.mxu3 %v233_v47  ;;  %v1102_v47 = vand.u32 4294901760, %v1101_v10 }
  0xc4   :  { %v3110_v32 = vpop.f32.mrf.mxu0 }
  0xc5   :  { %793 = vmatmul.f32.gmra.mxu1 %v2785_v27  ;;  %1103 = vmatpush.msra.mxu3 %v1102_v47 }
  0xc6   :  { %v3113_v34 = vpop.f32.mrf.mxu2  ;;  %v3115_v53 = vpop.f32.mrf.mxu3 }
  0xc7   :  { %708 = vmatmul.f32.gmra.mxu0 %v2820_v29  ;;  %1517 = vmatpush.msrb.mxu3 %v2896_v51 }
  0xc9   :  { %1519 = vmatpush.msrb.mxu3 %v2921_v18 }
  0xca   :  { %v3122_v59 = vpop.f32.mrf.mxu1 }
  0xcb   :  { %486 = vmatmul.f32.gmra.mxu2 %v2867_v5  ;;  %601 = vmatmul.f32.gmra.mxu3 %v241_v16  ;;  %v3155_v16 = vstv %s3792_s0 }
  0xcc   :  { %v3129_v27 = vpop.f32.mrf.mxu0  ;;  %1521 = vmatpush.msrb.mxu3 %v2946_v35  ;;  %v134_v5 = vadd.f32 %v2996_v55, %v3155_v16  ;;  %v142_v49 = vadd.f32 %v3019_v40, %v3155_v16 }
  0xcd   :  { %797 = vmatmul.f32.gmra.mxu1 %v2820_v29 }
  0xce   :  { %v3135_v19 = vpop.f32.mrf.mxu2  ;;  %v3137_v23 = vpop.f32.mrf.mxu3  ;;  %1523 = vmatpush.msrb.mxu3 %v2971_v25  ;;  %v319_v55 = vadd.f32 %v3027_v36, %v142_v49 }
  0xcf   :  { %712 = vmatmul.f32.gmra.mxu0 %v2856_v3 }
  0xd0   :  { %1525 = vmatpush.msrb.mxu3 %v2998_v6 }
  0xd2   :  { %v3146_v48 = vpop.f32.mrf.mxu1  ;;  %1527 = vmatpush.msrb.mxu3 %v3037_v41 }
  0xd3   :  { %607 = vmatmul.f32.gmra.mxu3 %v249_v9 }
  0xd4   :  { %v653_v29 = vpop.f32.mrf.mxu0  ;;  %1529 = vmatpush.msrb.mxu3 %v3078_v46 }
  0xd5   :  { %801 = vmatmul.f32.gmra.mxu1 %v2856_v3  ;;  %v315_v3 = vadd.f32 %v3011_v39, %v134_v5  ;;  %v150_v39 = vadd.f32 %v3035_v26, %v3155_v16 }
  0xd6   :  { %v3157_v51 = vpop.f32.mrf.mxu3  ;;  %v412_v18 = vpop.f32.mrf.mxu2  ;;  %1531 = vmatpush.msrb.mxu3 %v917_v20 }
  0xd7   :  { %v413_v61 = vadd.f32 %v412_v18, %v315_v3  ;;  %v323_v2 = vadd.f32 %v3052_v17, %v150_v39 }
  0xda   :  { %v742_v9 = vpop.f32.mrf.mxu1 }
  0xdc   :  { %v657_v54 = vpop.f32.mrf.mxu0 }
  0xde   :  { %v417_v35 = vpop.f32.mrf.mxu2  ;;  %v518_v37 = vpop.f32.mrf.mxu3 }
  0xdf   :  { %v519_v25 = vadd.f32 %v518_v37, %v413_v61  ;;  %v418_v33 = vadd.f32 %v417_v35, %v319_v55 }
  0xe1   :  { %v654_v14 = vadd.f32 %v653_v29, %v519_v25  ;;  %v158_v29 = vadd.f32 %v3060_v57, %v3155_v16 }
  0xe2   :  { %v746_v38 = vpop.f32.mrf.mxu1 }
  0xe3   :  { %v743_v6 = vadd.f32 %v742_v9, %v654_v14  ;;  %v327_v37 = vadd.f32 %v3068_v8, %v158_v29 }
  0xe4   :  { %v661_v31 = vpop.f32.mrf.mxu0 }
  0xe5   :  { %v805_v41 = vmul.f32 0.2, %v743_v6 }
  0xe6   :  { %v422_v60 = vpop.f32.mrf.mxu2  ;;  %v524_v7 = vpop.f32.mrf.mxu3 }
  0xe7   :  { %v821_v21 = vmax.f32 %v743_v6, %v805_v41  ;;  %v525_v46 = vadd.f32 %v524_v7, %v418_v33  ;;  %v423_v24 = vadd.f32 %v422_v60, %v323_v2 }
  0xe9   :  { %v848_v52 = vsel %vm54_vm0, %v821_v21, 0  ;;  %v658_v0 = vadd.f32 %v657_v54, %v525_v46 }
  0xea   :  { %v3171_v40 = vand.u32 4294901760, %v848_v52  ;;  %v750_v43 = vpop.f32.mrf.mxu1 }
  0xeb   :  { %v747_v36 = vadd.f32 %v746_v38, %v658_v0 }
  0xec   :  { %v920_v44 = vsub.f32 %v848_v52, %v3171_v40  ;;  %1105 = vmatmul.f32.vlgmr.msra.gmra.mxu3 %v3171_v40  ;;  %v665_v20 = vpop.f32.mrf.mxu0 }
  0xed   :  { %v806_v42 = vmul.f32 0.2, %v747_v36 }
  0xee   :  { %v921_v10 = vand.u32 4294901760, %v920_v44  ;;  %v427_v26 = vpop.f32.mrf.mxu2  ;;  %v530_v47 = vpop.f32.mrf.mxu3  ;;  %1203 = vmatmul.f32.vlgmr.msra.gmra.mxu0 %v920_v44 }
  0xef   :  { %v822_v18 = vmax.f32 %v747_v36, %v806_v42  ;;  %v531_v5 = vadd.f32 %v530_v47, %v423_v24  ;;  %v428_v14 = vadd.f32 %v427_v26, %v327_v37 }
  0xf0   :  { %v922_v9 = vsub.f32 %v920_v44, %v921_v10  ;;  %1309 = vmatmul.f32.vlgmr.msra.gmra.mxu1 %v921_v10 }
  0xf1   :  { %v851_v17 = vsel %vm54_vm0, %v822_v18, 0  ;;  %v662_v3 = vadd.f32 %v661_v31, %v531_v5  ;;  %v166_v31 = vadd.f32 %v3076_v62, %v3155_v16 }
  0xf2   :  { %v923_v54 = vand.u32 4294901760, %v922_v9  ;;  %v3179_v61 = vand.u32 4294901760, %v851_v17  ;;  %v754_v35 = vpop.f32.mrf.mxu1 }
  0xf3   :  { %v751_v49 = vadd.f32 %v750_v43, %v662_v3  ;;  %v331_v0 = vadd.f32 %v3089_v56, %v166_v31 }
  0xf4   :  { %924 = vmatmul.f32.vlgmr.msra.gmra.mxu2 %v923_v54  ;;  %1109 = vmatmul.f32.gmra.mxu3 %v3179_v61  ;;  %v928_v25 = vsub.f32 %v851_v17, %v3179_v61  ;;  %v669_v57 = vpop.f32.mrf.mxu0 }
  0xf5   :  { %v807_v38 = vmul.f32 0.2, %v751_v49 }
  0xf6   :  { %v432_v55 = vpop.f32.mrf.mxu2  ;;  %v536_v6 = vpop.f32.mrf.mxu3  ;;  %1208 = vmatmul.f32.gmra.mxu0 %v928_v25  ;;  %v929_v33 = vand.u32 4294901760, %v928_v25 }
  0xf7   :  { %v823_v41 = vmax.f32 %v751_v49, %v807_v38  ;;  %v537_v60 = vadd.f32 %v536_v6, %v428_v14  ;;  %v433_v36 = vadd.f32 %v432_v55, %v331_v0 }
  0xf8   :  { %1315 = vmatmul.f32.gmra.mxu1 %v929_v33  ;;  %v930_v8 = vsub.f32 %v928_v25, %v929_v33 }
  0xf9   :  { %v854_v7 = vsel %vm54_vm0, %v823_v41, 0  ;;  %v666_v39 = vadd.f32 %v665_v20, %v537_v60  ;;  %v174_v20 = vadd.f32 %v3094_v58, %v3155_v16 }
  0xfa   :  { %v3187_v21 = vand.u32 4294901760, %v854_v7  ;;  %v931_v46 = vand.u32 4294901760, %v930_v8  ;;  %v758_v52 = vpop.f32.mrf.mxu1 }
  0xfb   :  { %v755_v43 = vadd.f32 %v754_v35, %v666_v39  ;;  %v335_v3 = vadd.f32 %v3105_v13, %v174_v20 }
  0xfc   :  { %932 = vmatmul.f32.gmra.mxu2 %v931_v46  ;;  %1113 = vmatmul.f32.gmra.mxu3 %v3187_v21  ;;  %v936_v2 = vsub.f32 %v854_v7, %v3187_v21  ;;  %v673_v62 = vpop.f32.mrf.mxu0 }
  0xfd   :  { %v808_v44 = vmul.f32 0.2, %v755_v43 }
  0xfe   :  { %v437_v24 = vpop.f32.mrf.mxu2  ;;  %v542_v42 = vpop.f32.mrf.mxu3  ;;  %1213 = vmatmul.f32.gmra.mxu0 %v936_v2  ;;  %v937_v10 = vand.u32 4294901760, %v936_v2 }
  0xff   :  { %v824_v26 = vmax.f32 %v755_v43, %v808_v44  ;;  %v543_v47 = vadd.f32 %v542_v42, %v433_v36  ;;  %v438_v37 = vadd.f32 %v437_v24, %v335_v3 }
 0x100   :  { %1321 = vmatmul.f32.gmra.mxu1 %v937_v10  ;;  %v938_v56 = vsub.f32 %v936_v2, %v937_v10 }
 0x101   :  { %v857_v29 = vsel %vm54_vm0, %v824_v26, 0  ;;  %v670_v18 = vadd.f32 %v669_v57, %v543_v47  ;;  %v182_v57 = vadd.f32 %v3110_v32, %v3155_v16 }
 0x102   :  { %v3195_v5 = vand.u32 4294901760, %v857_v29  ;;  %v939_v9 = vand.u32 4294901760, %v938_v56  ;;  %v762_v17 = vpop.f32.mrf.mxu1 }
 0x103   :  { %v759_v54 = vadd.f32 %v758_v52, %v670_v18  ;;  %v339_v7 = vadd.f32 %v3122_v59, %v182_v57 }
 0x104   :  { %940 = vmatmul.f32.gmra.mxu2 %v939_v9  ;;  %1117 = vmatmul.f32.gmra.mxu3 %v3195_v5  ;;  %v944_v35 = vsub.f32 %v857_v29, %v3195_v5  ;;  %v677_v58 = vpop.f32.mrf.mxu0 }
 0x105   :  { %v809_v49 = vmul.f32 0.2, %v759_v54 }
 0x106   :  { %v442_v25 = vpop.f32.mrf.mxu2  ;;  %v548_v14 = vpop.f32.mrf.mxu3  ;;  %1218 = vmatmul.f32.gmra.mxu0 %v944_v35  ;;  %v945_v38 = vand.u32 4294901760, %v944_v35 }
 0x107   :  { %v825_v55 = vmax.f32 %v759_v54, %v809_v49  ;;  %v549_v6 = vadd.f32 %v548_v14, %v438_v37  ;;  %v443_v52 = vadd.f32 %v442_v25, %v339_v7 }
 0x108   :  { %1327 = vmatmul.f32.gmra.mxu1 %v945_v38  ;;  %v946_v13 = vsub.f32 %v944_v35, %v945_v38 }
 0x109   :  { %v860_v33 = vsel %vm54_vm0, %v825_v55, 0  ;;  %v674_v31 = vadd.f32 %v673_v62, %v549_v6  ;;  %v190_v62 = vadd.f32 %v3129_v27, %v3155_v16 }
 0x10a   :  { %v3203_v41 = vand.u32 4294901760, %v860_v33  ;;  %v947_v60 = vand.u32 4294901760, %v946_v13  ;;  %v766_v8 = vpop.f32.mrf.mxu1 }
 0x10b   :  { %v763_v39 = vadd.f32 %v762_v17, %v674_v31  ;;  %v343_v56 = vadd.f32 %v3146_v48, %v190_v62 }
 0x10c   :  { %948 = vmatmul.f32.gmra.mxu2 %v947_v60  ;;  %1121 = vmatmul.f32.gmra.mxu3 %v3203_v41  ;;  %v952_v46 = vsub.f32 %v860_v33, %v3203_v41  ;;  %v681_v32 = vpop.f32.mrf.mxu0 }
 0x10d   :  { %v810_v0 = vmul.f32 0.2, %v763_v39 }
 0x10e   :  { %v447_v43 = vpop.f32.mrf.mxu2  ;;  %v554_v2 = vpop.f32.mrf.mxu3  ;;  %1223 = vmatmul.f32.gmra.mxu0 %v952_v46  ;;  %v953_v36 = vand.u32 4294901760, %v952_v46 }
 0x10f   :  { %v826_v44 = vmax.f32 %v763_v39, %v810_v0  ;;  %v555_v24 = vadd.f32 %v554_v2, %v443_v52  ;;  %v448_v9 = vadd.f32 %v447_v43, %v343_v56 }
 0x110   :  { %1333 = vmatmul.f32.gmra.mxu1 %v953_v36  ;;  %v954_v59 = vsub.f32 %v952_v46, %v953_v36  ;;  %v206_v46 = vadd.f32 %v3022_v22, %v3155_v16 }
 0x111   :  { %v863_v42 = vsel %vm54_vm0, %v826_v44, 0  ;;  %v678_v10 = vadd.f32 %v677_v58, %v555_v24  ;;  %v198_v58 = vadd.f32 %v3001_v15, %v3155_v16 }
 0x112   :  { %v3211_v20 = vand.u32 4294901760, %v863_v42  ;;  %v955_v26 = vand.u32 4294901760, %v954_v59  ;;  %v770_v47 = vpop.f32.mrf.mxu1  ;;  %v351_v44 = vadd.f32 %v3042_v50, %v206_v46 }
 0x113   :  { %v767_v29 = vadd.f32 %v766_v8, %v678_v10  ;;  %v347_v6 = vadd.f32 %v3024_v11, %v198_v58 }
 0x114   :  { %956 = vmatmul.f32.gmra.mxu2 %v955_v26  ;;  %1125 = vmatmul.f32.gmra.mxu3 %v3211_v20  ;;  %v960_v18 = vsub.f32 %v863_v42, %v3211_v20  ;;  %v685_v27 = vpop.f32.mrf.mxu0 }
 0x115   :  { %v811_v17 = vmul.f32 0.2, %v767_v29 }
 0x116   :  { %v452_v3 = vpop.f32.mrf.mxu2  ;;  %v560_v54 = vpop.f32.mrf.mxu3  ;;  %1228 = vmatmul.f32.gmra.mxu0 %v960_v18  ;;  %v961_v35 = vand.u32 4294901760, %v960_v18 }
 0x117   :  { %v827_v37 = vmax.f32 %v767_v29, %v811_v17  ;;  %v561_v49 = vadd.f32 %v560_v54, %v448_v9  ;;  %v453_v31 = vadd.f32 %v452_v3, %v347_v6  ;;  %v214_v29 = vadd.f32 %v3040_v30, %v3155_v16 }
 0x118   :  { %1339 = vmatmul.f32.gmra.mxu1 %v961_v35  ;;  %v962_v48 = vsub.f32 %v960_v18, %v961_v35  ;;  %v222_v6 = vadd.f32 %v3063_v1, %v3155_v16 }
 0x119   :  { %v866_v25 = vsel %vm54_vm0, %v827_v37, 0  ;;  %v682_v14 = vadd.f32 %v681_v32, %v561_v49  ;;  %v355_v58 = vadd.f32 %v3065_v4, %v214_v29 }
 0x11a   :  { %v3219_v38 = vand.u32 4294901760, %v866_v25  ;;  %v963_v57 = vand.u32 4294901760, %v962_v48  ;;  %v774_v55 = vpop.f32.mrf.mxu1 }
 0x11b   :  { %v771_v13 = vadd.f32 %v770_v47, %v682_v14 }
 0x11c   :  { %964 = vmatmul.f32.gmra.mxu2 %v963_v57  ;;  %1129 = vmatmul.f32.gmra.mxu3 %v3219_v38  ;;  %v968_v33 = vsub.f32 %v866_v25, %v3219_v38  ;;  %v689_v15 = vpop.f32.mrf.mxu0 }
 0x11d   :  { %v812_v60 = vmul.f32 0.2, %v771_v13 }
 0x11e   :  { %v457_v8 = vpop.f32.mrf.mxu2  ;;  %v566_v7 = vpop.f32.mrf.mxu3  ;;  %1233 = vmatmul.f32.gmra.mxu0 %v968_v33  ;;  %v969_v39 = vand.u32 4294901760, %v968_v33 }
 0x11f   :  { %v828_v32 = vmax.f32 %v771_v13, %v812_v60  ;;  %v567_v52 = vadd.f32 %v566_v7, %v453_v31  ;;  %v458_v42 = vadd.f32 %v457_v8, %v351_v44 }
 0x120   :  { %1345 = vmatmul.f32.gmra.mxu1 %v969_v39  ;;  %v970_v11 = vsub.f32 %v968_v33, %v969_v39  ;;  %v359_v39 = vadd.f32 %v3083_v12, %v222_v6 }
 0x121   :  { %v869_v0 = vsel %vm54_vm0, %v828_v32, 0  ;;  %v686_v43 = vadd.f32 %v685_v27, %v567_v52 }
 0x122   :  { %v3227_v2 = vand.u32 4294901760, %v869_v0  ;;  %v971_v36 = vand.u32 4294901760, %v970_v11  ;;  %v778_v62 = vpop.f32.mrf.mxu1 }
 0x123   :  { %v775_v24 = vadd.f32 %v774_v55, %v686_v43 }
 0x124   :  { %972 = vmatmul.f32.gmra.mxu2 %v971_v36  ;;  %1133 = vmatmul.f32.gmra.mxu3 %v3227_v2  ;;  %v976_v59 = vsub.f32 %v869_v0, %v3227_v2  ;;  %v693_v22 = vpop.f32.mrf.mxu0  ;;  %v230_v36 = vadd.f32 %v3081_v63, %v3155_v16 }
 0x125   :  { %v813_v10 = vmul.f32 0.2, %v775_v24 }
 0x126   :  { %v462_v26 = vpop.f32.mrf.mxu2  ;;  %v572_v47 = vpop.f32.mrf.mxu3  ;;  %1238 = vmatmul.f32.gmra.mxu0 %v976_v59  ;;  %v977_v56 = vand.u32 4294901760, %v976_v59 }
 0x127   :  { %v829_v18 = vmax.f32 %v775_v24, %v813_v10  ;;  %v573_v27 = vadd.f32 %v572_v47, %v458_v42  ;;  %v463_v30 = vadd.f32 %v462_v26, %v355_v58  ;;  %v363_v47 = vadd.f32 %v3099_v45, %v230_v36 }
 0x128   :  { %1351 = vmatmul.f32.gmra.mxu1 %v977_v56  ;;  %v978_v50 = vsub.f32 %v976_v59, %v977_v56 }
 0x129   :  { %v872_v9 = vsel %vm54_vm0, %v829_v18, 0  ;;  %v690_v17 = vadd.f32 %v689_v15, %v573_v27 }
 0x12a   :  { %v3235_v3 = vand.u32 4294901760, %v872_v9  ;;  %v979_v54 = vand.u32 4294901760, %v978_v50  ;;  %v782_v35 = vpop.f32.mrf.mxu1 }
 0x12b   :  { %v779_v37 = vadd.f32 %v778_v62, %v690_v17  ;;  %v238_v17 = vadd.f32 %v3097_v28, %v3155_v16 }
 0x12c   :  { %980 = vmatmul.f32.gmra.mxu2 %v979_v54  ;;  %1137 = vmatmul.f32.gmra.mxu3 %v3235_v3  ;;  %v984_v49 = vsub.f32 %v872_v9, %v3235_v3  ;;  %v697_v25 = vpop.f32.mrf.mxu0 }
 0x12d   :  { %v814_v48 = vmul.f32 0.2, %v779_v37 }
 0x12e   :  { %v467_v14 = vpop.f32.mrf.mxu2  ;;  %v578_v57 = vpop.f32.mrf.mxu3  ;;  %1243 = vmatmul.f32.gmra.mxu0 %v984_v49  ;;  %v985_v55 = vand.u32 4294901760, %v984_v49 }
 0x12f   :  { %v830_v13 = vmax.f32 %v779_v37, %v814_v48  ;;  %v579_v33 = vadd.f32 %v578_v57, %v463_v30  ;;  %v468_v1 = vadd.f32 %v467_v14, %v359_v39 }
 0x130   :  { %1357 = vmatmul.f32.gmra.mxu1 %v985_v55  ;;  %v986_v4 = vsub.f32 %v984_v49, %v985_v55 }
 0x131   :  { %v875_v15 = vsel %vm54_vm0, %v830_v13, 0  ;;  %v694_v31 = vadd.f32 %v693_v22, %v579_v33 }
 0x132   :  { %v3243_v60 = vand.u32 4294901760, %v875_v15  ;;  %v987_v8 = vand.u32 4294901760, %v986_v4  ;;  %v786_v7 = vpop.f32.mrf.mxu1  ;;  %v246_v4 = vadd.f32 %v3113_v34, %v3155_v16 }
 0x133   :  { %v783_v46 = vadd.f32 %v782_v35, %v694_v31 }
 0x134   :  { %988 = vmatmul.f32.gmra.mxu2 %v987_v8  ;;  %1141 = vmatmul.f32.gmra.mxu3 %v3243_v60  ;;  %v992_v32 = vsub.f32 %v875_v15, %v3243_v60  ;;  %v701_v12 = vpop.f32.mrf.mxu0 }
 0x135   :  { %v815_v52 = vmul.f32 0.2, %v783_v46 }
 0x136   :  { %v472_v11 = vpop.f32.mrf.mxu2  ;;  %v584_v0 = vpop.f32.mrf.mxu3  ;;  %1248 = vmatmul.f32.gmra.mxu0 %v992_v32  ;;  %v993_v43 = vand.u32 4294901760, %v992_v32 }
 0x137   :  { %v831_v62 = vmax.f32 %v783_v46, %v815_v52  ;;  %v585_v44 = vadd.f32 %v584_v0, %v468_v1  ;;  %v473_v29 = vadd.f32 %v472_v11, %v363_v47  ;;  %v371_v1 = vadd.f32 %v3137_v23, %v246_v4 }
 0x138   :  { %1363 = vmatmul.f32.gmra.mxu1 %v993_v43  ;;  %v994_v24 = vsub.f32 %v992_v32, %v993_v43 }
 0x139   :  { %v878_v59 = vsel %vm54_vm0, %v831_v62, 0  ;;  %v698_v22 = vadd.f32 %v697_v25, %v585_v44  ;;  %v367_v25 = vadd.f32 %v3115_v53, %v238_v17 }
 0x13a   :  { %v3251_v42 = vand.u32 4294901760, %v878_v59  ;;  %v995_v10 = vand.u32 4294901760, %v994_v24  ;;  %v790_v26 = vpop.f32.mrf.mxu1  ;;  %v254_v24 = vadd.f32 %v3135_v19, %v3155_v16 }
 0x13b   :  { %v787_v56 = vadd.f32 %v786_v7, %v698_v22 }
 0x13c   :  { %996 = vmatmul.f32.gmra.mxu2 %v995_v10  ;;  %1145 = vmatmul.f32.gmra.mxu3 %v3251_v42  ;;  %v1000_v63 = vsub.f32 %v878_v59, %v3251_v42  ;;  %v705_v48 = vpop.f32.mrf.mxu0 }
 0x13d   :  { %v816_v18 = vmul.f32 0.2, %v787_v56 }
 0x13e   :  { %v477_v27 = vpop.f32.mrf.mxu2  ;;  %v590_v50 = vpop.f32.mrf.mxu3  ;;  %1253 = vmatmul.f32.gmra.mxu0 %v1000_v63  ;;  %v1001_v9 = vand.u32 4294901760, %v1000_v63 }
 0x13f   :  { %v832_v54 = vmax.f32 %v787_v56, %v816_v18  ;;  %v591_v35 = vadd.f32 %v590_v50, %v473_v29  ;;  %v478_v55 = vadd.f32 %v477_v27, %v367_v25 }
 0x140   :  { %1369 = vmatmul.f32.gmra.mxu1 %v1001_v9  ;;  %v1002_v58 = vsub.f32 %v1000_v63, %v1001_v9  ;;  %v375_v63 = vadd.f32 %v3157_v51, %v254_v24 }
 0x141   :  { %v881_v45 = vsel %vm54_vm0, %v832_v54, 0  ;;  %v702_v37 = vadd.f32 %v701_v12, %v591_v35 }
 0x142   :  { %v3259_v49 = vand.u32 4294901760, %v881_v45  ;;  %v1003_v30 = vand.u32 4294901760, %v1002_v58  ;;  %v794_v28 = vpop.f32.mrf.mxu1 }
 0x143   :  { %v791_v14 = vadd.f32 %v790_v26, %v702_v37 }
 0x144   :  { %1004 = vmatmul.f32.gmra.mxu2 %v1003_v30  ;;  %1149 = vmatmul.f32.gmra.mxu3 %v3259_v49  ;;  %v1008_v57 = vsub.f32 %v881_v45, %v3259_v49  ;;  %v709_v34 = vpop.f32.mrf.mxu0 }
 0x145   :  { %v817_v6 = vmul.f32 0.2, %v791_v14 }
 0x146   :  { %v596_v13 = vpop.f32.mrf.mxu3  ;;  %1258 = vmatmul.f32.gmra.mxu0 %v1008_v57  ;;  %v1009_v33 = vand.u32 4294901760, %v1008_v57  ;;  %v482_v8 = vpop.f32.mrf.mxu2 }
 0x147   :  { %v833_v15 = vmax.f32 %v791_v14, %v817_v6  ;;  %v597_v31 = vadd.f32 %v596_v13, %v478_v55  ;;  %v483_v0 = vadd.f32 %v482_v8, %v371_v1 }
 0x148   :  { %1375 = vmatmul.f32.gmra.mxu1 %v1009_v33  ;;  %v1010_v53 = vsub.f32 %v1008_v57, %v1009_v33 }
 0x149   :  { %v884_v7 = vsel %vm54_vm0, %v833_v15, 0  ;;  %v706_v39 = vadd.f32 %v705_v48, %v597_v31 }
 0x14a   :  { %v3267_v46 = vand.u32 4294901760, %v884_v7  ;;  %v1011_v32 = vand.u32 4294901760, %v1010_v53  ;;  %v798_v44 = vpop.f32.mrf.mxu1  ;;  %v1636_v53 = vld [vmem:[%s3793_s5 + $0x38] sm:$0xff] }
 0x14b   :  { %v795_v52 = vadd.f32 %v794_v28, %v706_v39 }
 0x14c   :  { %1012 = vmatmul.f32.gmra.mxu2 %v1011_v32  ;;  %1153 = vmatmul.f32.gmra.mxu3 %v3267_v46  ;;  %v1016_v11 = vsub.f32 %v884_v7, %v3267_v46  ;;  %v713_v50 = vpop.f32.mrf.mxu0  ;;  %v3294_v7 = vand.u32 4294901760, %v1636_v53 }
 0x14d   :  { %v818_v43 = vmul.f32 0.2, %v795_v52 }
 0x14e   :  { %v602_v36 = vpop.f32.mrf.mxu3  ;;  %1263 = vmatmul.f32.gmra.mxu0 %v1016_v11  ;;  %v1017_v62 = vand.u32 4294901760, %v1016_v11  ;;  %v487_v47 = vpop.f32.mrf.mxu2  ;;  %v3298_v39 = vsub.f32 %v1636_v53, %v3294_v7  ;;  %2085 = vmatpush.msra.mxu3 %v3294_v7  ;;  %v1632_v53 = vld [vmem:[%s3793_s5 + $0x18] sm:$0xff] }
 0x14f   :  { %v834_v12 = vmax.f32 %v795_v52, %v818_v43  ;;  %v603_v59 = vadd.f32 %v602_v36, %v483_v0  ;;  %v488_v19 = vadd.f32 %v487_v47, %v375_v63  ;;  %1698 = vmatpush.msrb.mxu0 %v3294_v7 }
 0x150   :  { %1381 = vmatmul.f32.gmra.mxu1 %v1017_v62  ;;  %v1018_v23 = vsub.f32 %v1016_v11, %v1017_v62  ;;  %v1852_v1 = vand.u32 4294901760, %v3298_v39  ;;  %1973 = vmatpush.msra.mxu2 %v3298_v39 }
 0x151   :  { %v887_v22 = vsel %vm54_vm0, %v834_v12, 0  ;;  %v710_v10 = vadd.f32 %v709_v34, %v603_v59  ;;  %v3311_v34 = vstv %s3794_s1 }
 0x152   :  { %v3275_v26 = vand.u32 4294901760, %v887_v22  ;;  %v1019_v56 = vand.u32 4294901760, %v1018_v23  ;;  %v802_v35 = vpop.f32.mrf.mxu1  ;;  %v1853_v52 = vsub.f32 %v3298_v39, %v1852_v1 }
 0x153   :  { %v799_v29 = vadd.f32 %v798_v44, %v710_v10  ;;  %v1635_v44 = vld [vmem:[%s3793_s5 + $0x30] sm:$0xff] }
 0x154   :  { %1020 = vmatmul.f32.gmra.mxu2 %v1019_v56  ;;  %1157 = vmatmul.f32.gmra.mxu3 %v3275_v26  ;;  %v1024_v18 = vsub.f32 %v887_v22, %v3275_v26  ;;  %v1854_v11 = vand.u32 4294901760, %v1853_v52 }
 0x155   :  { %v819_v16 = vmul.f32 0.2, %v799_v29 }
 0x156   :  { %v608_v27 = vpop.f32.mrf.mxu3  ;;  %1268 = vmatmul.f32.gmra.mxu0 %v1024_v18  ;;  %v1025_v9 = vand.u32 4294901760, %v1024_v18  ;;  %1855 = vmatpush.msrb.mxu1 %v1854_v11 }
 0x157   :  { %v835_v17 = vmax.f32 %v799_v29, %v819_v16  ;;  %v609_v54 = vadd.f32 %v608_v27, %v488_v19  ;;  %v1634_v19 = vld [vmem:[%s3793_s5 + $0x28] sm:$0xff] }
 0x158   :  { %1387 = vmatmul.f32.gmra.mxu1 %v1025_v9  ;;  %v1026_v58 = vsub.f32 %v1024_v18, %v1025_v9  ;;  %v3346_v16 = vand.u32 4294901760, %v1634_v19 }
 0x159   :  { %v890_v45 = vsel %vm54_vm0, %v835_v17, 0  ;;  %v714_v51 = vadd.f32 %v713_v50, %v609_v54 }
 0x15a   :  { %v3281_v37 = vand.u32 4294901760, %v890_v45  ;;  %v1027_v30 = vand.u32 4294901760, %v1026_v58 }
 0x15b   :  { %v803_v48 = vadd.f32 %v802_v35, %v714_v51 }
 0x15c   :  { %1028 = vmatmul.f32.gmra.mxu2 %v1027_v30  ;;  %1161 = vmatmul.f32.gmra.mxu3 %v3281_v37  ;;  %v1032_v25 = vsub.f32 %v890_v45, %v3281_v37 }
 0x15d   :  { %v820_v14 = vmul.f32 0.2, %v803_v48 }
 0x15e   :  { %1273 = vmatmul.f32.gmra.mxu0 %v1032_v25  ;;  %v1033_v57 = vand.u32 4294901760, %v1032_v25 }
 0x15f   :  { %v836_v28 = vmax.f32 %v803_v48, %v820_v14  ;;  %v1633_v48 = vld [vmem:[%s3793_s5 + $0x20] sm:$0xff] }
 0x160   :  { %1393 = vmatmul.f32.gmra.mxu1 %v1033_v57  ;;  %v1034_v55 = vsub.f32 %v1032_v25, %v1033_v57  ;;  %v3371_v25 = vand.u32 4294901760, %v1633_v48 }
 0x161   :  { %v893_v6 = vsel %vm54_vm0, %v836_v28, 0 }
 0x162   :  { %v3286_v13 = vand.u32 4294901760, %v893_v6  ;;  %v1035_v33 = vand.u32 4294901760, %v1034_v55 }
 0x164   :  { %1036 = vmatmul.f32.gmra.mxu2 %v1035_v33  ;;  %1165 = vmatmul.f32.gmra.mxu3 %v3286_v13  ;;  %v1040_v4 = vsub.f32 %v893_v6, %v3286_v13 }
 0x166   :  { %1278 = vmatmul.f32.gmra.mxu0 %v1040_v4  ;;  %v1041_v15 = vand.u32 4294901760, %v1040_v4 }
 0x168   :  { %1399 = vmatmul.f32.gmra.mxu1 %v1041_v15  ;;  %v1042_v31 = vsub.f32 %v1040_v4, %v1041_v15 }
 0x16a   :  { %v1043_v8 = vand.u32 4294901760, %v1042_v31 }
 0x16c   :  { %1044 = vmatmul.f32.gmra.mxu2 %v1043_v8  ;;  %1533 = vmatmul.f32.vlgmr.msrb.gmra.mxu3 %v3171_v40 }
 0x16f   :  { %v1106_v32 = vpop.f32.mrf.mxu3 }
 0x174   :  { %1444 = vmatmul.f32.vlgmr.msrb.gmra.mxu2 %v3171_v40  ;;  %1537 = vmatmul.f32.gmra.mxu3 %v3179_v61  ;;  %v3321_v40 = vand.u32 4294901760, %v1635_v44 }
 0x176   :  { %1700 = vmatpush.msrb.mxu0 %v3321_v40  ;;  %v3325_v24 = vsub.f32 %v1635_v44, %v3321_v40  ;;  %2087 = vmatpush.msra.mxu3 %v3321_v40 }
 0x177   :  { %v925_v0 = vpop.f32.mrf.mxu2  ;;  %v1110_v43 = vpop.f32.mrf.mxu3 }
 0x178   :  { %v926_v36 = vadd.f32 %v925_v0, %v3311_v34  ;;  %v1858_v22 = vand.u32 4294901760, %v3325_v24  ;;  %1976 = vmatpush.msra.mxu2 %v3325_v24  ;;  %1702 = vmatpush.msrb.mxu0 %v3346_v16 }
 0x179   :  { %2089 = vmatpush.msra.mxu3 %v3346_v16 }
 0x17a   :  { %v3314_v62 = vadd.f32 %v1106_v32, %v926_v36  ;;  %v1859_v10 = vsub.f32 %v3325_v24, %v1858_v22  ;;  %1704 = vmatpush.msrb.mxu0 %v3371_v25  ;;  %v3396_v32 = vand.u32 4294901760, %v1632_v53 }
 0x17b   :  { %2091 = vmatpush.msra.mxu3 %v3371_v25 }
 0x17c   :  { %1448 = vmatmul.f32.gmra.mxu2 %v3179_v61  ;;  %1541 = vmatmul.f32.gmra.mxu3 %v3187_v21  ;;  %v1860_v47 = vand.u32 4294901760, %v1859_v10 }
 0x17d   :  { %1706 = vmatpush.msrb.mxu0 %v3396_v32  ;;  %2093 = vmatpush.msra.mxu3 %v3396_v32 }
 0x17e   :  { %1861 = vmatpush.msrb.mxu1 %v1860_v47 }
 0x17f   :  { %v933_v12 = vpop.f32.mrf.mxu2  ;;  %v1114_v59 = vpop.f32.mrf.mxu3 }
 0x180   :  { %v934_v23 = vadd.f32 %v933_v12, %v3311_v34 }
 0x182   :  { %v3331_v61 = vadd.f32 %v1110_v43, %v934_v23  ;;  %v1631_v23 = vld [vmem:[%s3793_s5 + $0x10] sm:$0xff] }
 0x183   :  { %v3424_v10 = vand.u32 4294901760, %v1631_v23 }
 0x184   :  { %1452 = vmatmul.f32.gmra.mxu2 %v3187_v21  ;;  %1545 = vmatmul.f32.gmra.mxu3 %v3195_v5  ;;  %v3350_v21 = vsub.f32 %v1634_v19, %v3346_v16 }
 0x185   :  { %1708 = vmatpush.msrb.mxu0 %v3424_v10  ;;  %2095 = vmatpush.msra.mxu3 %v3424_v10 }
 0x186   :  { %v1864_v17 = vand.u32 4294901760, %v3350_v21  ;;  %1979 = vmatpush.msra.mxu2 %v3350_v21 }
 0x187   :  { %v941_v56 = vpop.f32.mrf.mxu2  ;;  %v1118_v63 = vpop.f32.mrf.mxu3 }
 0x188   :  { %v942_v29 = vadd.f32 %v941_v56, %v3311_v34  ;;  %v1865_v54 = vsub.f32 %v3350_v21, %v1864_v17 }
 0x18a   :  { %v3339_v18 = vadd.f32 %v1114_v59, %v942_v29  ;;  %v1866_v35 = vand.u32 4294901760, %v1865_v54 }
 0x18c   :  { %1456 = vmatmul.f32.gmra.mxu2 %v3195_v5  ;;  %1549 = vmatmul.f32.gmra.mxu3 %v3203_v41 }
 0x18d   :  { %1867 = vmatpush.msrb.mxu1 %v1866_v35 }
 0x18f   :  { %v949_v27 = vpop.f32.mrf.mxu2  ;;  %v1122_v50 = vpop.f32.mrf.mxu3 }
 0x190   :  { %v950_v9 = vadd.f32 %v949_v27, %v3311_v34 }
 0x192   :  { %v3356_v5 = vadd.f32 %v1118_v63, %v950_v9 }
 0x194   :  { %1460 = vmatmul.f32.gmra.mxu2 %v3203_v41  ;;  %1553 = vmatmul.f32.gmra.mxu3 %v3211_v20  ;;  %v3375_v41 = vsub.f32 %v1633_v48, %v3371_v25 }
 0x196   :  { %v1870_v55 = vand.u32 4294901760, %v3375_v41  ;;  %1982 = vmatpush.msra.mxu2 %v3375_v41 }
 0x197   :  { %v957_v58 = vpop.f32.mrf.mxu2  ;;  %v1126_v45 = vpop.f32.mrf.mxu3 }
 0x198   :  { %v958_v51 = vadd.f32 %v957_v58, %v3311_v34  ;;  %v1871_v6 = vsub.f32 %v3375_v41, %v1870_v55 }
 0x19a   :  { %v3364_v30 = vadd.f32 %v1122_v50, %v958_v51  ;;  %v1872_v33 = vand.u32 4294901760, %v1871_v6  ;;  %v1630_v50 = vld [vmem:[%s3793_s5 + $0x8] sm:$0xff]  ;;  %v1204_v51 = vpop.f32.mrf.mxu0 }
 0x19b   :  { %v1709_v9 = vand.u32 4294901760, %v1630_v50 }
 0x19c   :  { %1464 = vmatmul.f32.gmra.mxu2 %v3211_v20  ;;  %1557 = vmatmul.f32.gmra.mxu3 %v3219_v38 }
 0x19d   :  { %1873 = vmatpush.msrb.mxu1 %v1872_v33  ;;  %1710 = vmatpush.msrb.mxu0 %v1709_v9  ;;  %v1887_v54 = vsub.f32 %v1630_v50, %v1709_v9 }
 0x19e   :  { %2097 = vmatpush.msra.mxu3 %v1709_v9 }
 0x19f   :  { %v965_v14 = vpop.f32.mrf.mxu2  ;;  %v1130_v57 = vpop.f32.mrf.mxu3  ;;  %v1888_v58 = vand.u32 4294901760, %v1887_v54 }
 0x1a0   :  { %v966_v28 = vadd.f32 %v965_v14, %v3311_v34 }
 0x1a2   :  { %v3381_v20 = vadd.f32 %v1126_v45, %v966_v28  ;;  %v1889_v45 = vsub.f32 %v1887_v54, %v1888_v58  ;;  %v1629_v28 = vld [vmem:[%s3793_s5] sm:$0xff] }
 0x1a3   :  { %v1711_v6 = vand.u32 4294901760, %v1629_v28 }
 0x1a4   :  { %1468 = vmatmul.f32.gmra.mxu2 %v3219_v38  ;;  %1561 = vmatmul.f32.gmra.mxu3 %v3227_v2  ;;  %v3400_v38 = vsub.f32 %v1632_v53, %v3396_v32  ;;  %v1890_v48 = vand.u32 4294901760, %v1889_v45 }
 0x1a5   :  { %1712 = vmatpush.msrb.mxu0 %v1711_v6  ;;  %v1893_v33 = vsub.f32 %v1629_v28, %v1711_v6  ;;  %2099 = vmatpush.msra.mxu3 %v1711_v6 }
 0x1a6   :  { %v1876_v43 = vand.u32 4294901760, %v3400_v38  ;;  %1985 = vmatpush.msra.mxu2 %v3400_v38 }
 0x1a7   :  { %v973_v4 = vpop.f32.mrf.mxu2  ;;  %v1134_v15 = vpop.f32.mrf.mxu3  ;;  %2208 = vmatpush.msra.mxu0 %v1852_v1 }
 0x1a8   :  { %v974_v31 = vadd.f32 %v973_v4, %v3311_v34  ;;  %v1877_v36 = vsub.f32 %v3400_v38, %v1876_v43  ;;  %v1894_v4 = vand.u32 4294901760, %v1893_v33 }
 0x1a9   :  { %2212 = vmatpush.msra.mxu0 %v1858_v22 }
 0x1aa   :  { %v3389_v8 = vadd.f32 %v1130_v57, %v974_v31  ;;  %v1878_v44 = vand.u32 4294901760, %v1877_v36 }
 0x1ab   :  { %2216 = vmatpush.msra.mxu0 %v1864_v17  ;;  %v1205_v17 = vadd.f32 %v1204_v51, %v3314_v62 }
 0x1ac   :  { %1472 = vmatmul.f32.gmra.mxu2 %v3227_v2  ;;  %1565 = vmatmul.f32.gmra.mxu3 %v3235_v3 }
 0x1ad   :  { %1879 = vmatpush.msrb.mxu1 %v1878_v44  ;;  %2220 = vmatpush.msra.mxu0 %v1870_v55 }
 0x1af   :  { %v981_v52 = vpop.f32.mrf.mxu2  ;;  %v3403_v11 = vpop.f32.mrf.mxu3  ;;  %2224 = vmatpush.msra.mxu0 %v1876_v43 }
 0x1b0   :  { %v982_v0 = vadd.f32 %v981_v52, %v3311_v34 }
 0x1b2   :  { %v3408_v2 = vadd.f32 %v1134_v15, %v982_v0  ;;  %v1895_v15 = vsub.f32 %v1893_v33, %v1894_v4 }
 0x1b4   :  { %1476 = vmatmul.f32.gmra.mxu2 %v3235_v3  ;;  %1569 = vmatmul.f32.gmra.mxu3 %v3243_v60  ;;  %v1881_v3 = vsub.f32 %v1631_v23, %v3424_v10  ;;  %v1896_v1 = vand.u32 4294901760, %v1895_v15 }
 0x1b6   :  { %v1882_v63 = vand.u32 4294901760, %v1881_v3  ;;  %1988 = vmatpush.msra.mxu2 %v1881_v3 }
 0x1b7   :  { %v3415_v12 = vpop.f32.mrf.mxu2  ;;  %v3417_v59 = vpop.f32.mrf.mxu3 }
 0x1b8   :  { %v1883_v29 = vsub.f32 %v1881_v3, %v1882_v63  ;;  %1991 = vmatpush.msra.mxu2 %v1887_v54  ;;  %2228 = vmatpush.msra.mxu0 %v1882_v63 }
 0x1ba   :  { %1994 = vmatpush.msra.mxu2 %v1893_v33  ;;  %2232 = vmatpush.msra.mxu0 %v1888_v58 }
 0x1bc   :  { %1480 = vmatmul.f32.gmra.mxu2 %v3243_v60  ;;  %1573 = vmatmul.f32.gmra.mxu3 %v3251_v42  ;;  %v1884_v60 = vand.u32 4294901760, %v1883_v29 }
 0x1bd   :  { %2236 = vmatpush.msra.mxu0 %v1894_v4 }
 0x1be   :  { %1885 = vmatpush.msrb.mxu1 %v1884_v60 }
 0x1bf   :  { %v3429_v47 = vpop.f32.mrf.mxu2  ;;  %v3431_v56 = vpop.f32.mrf.mxu3 }
 0x1c0   :  { %1891 = vmatpush.msrb.mxu1 %v1890_v48 }
 0x1c2   :  { %1897 = vmatpush.msrb.mxu1 %v1896_v1 }
 0x1c4   :  { %1484 = vmatmul.f32.gmra.mxu2 %v3251_v42  ;;  %1577 = vmatmul.f32.gmra.mxu3 %v3259_v49 }
 0x1c5   :  { %2311 = vmatpush.msra.mxu1 %v3294_v7 }
 0x1c7   :  { %v3435_v19 = vpop.f32.mrf.mxu2  ;;  %v3437_v27 = vpop.f32.mrf.mxu3  ;;  %2313 = vmatpush.msra.mxu1 %v3321_v40 }
 0x1c9   :  { %2315 = vmatpush.msra.mxu1 %v3346_v16 }
 0x1cb   :  { %2317 = vmatpush.msra.mxu1 %v3371_v25 }
 0x1cc   :  { %1488 = vmatmul.f32.gmra.mxu2 %v3259_v49  ;;  %1581 = vmatmul.f32.gmra.mxu3 %v3267_v46  ;;  %v1310_v49 = vpop.f32.mrf.mxu1 }
 0x1cd   :  { %2319 = vmatpush.msra.mxu1 %v3396_v32  ;;  %v1311_v41 = vadd.f32 %v1310_v49, %v1205_v17 }
 0x1cf   :  { %v3444_v42 = vpop.f32.mrf.mxu2  ;;  %v3446_v35 = vpop.f32.mrf.mxu3  ;;  %2321 = vmatpush.msra.mxu1 %v3424_v10 }
 0x1d1   :  { %2323 = vmatpush.msra.mxu1 %v1709_v9 }
 0x1d3   :  { %2325 = vmatpush.msra.mxu1 %v1711_v6 }
 0x1d4   :  { %1492 = vmatmul.f32.gmra.mxu2 %v3267_v46  ;;  %1585 = vmatmul.f32.gmra.mxu3 %v3275_v26  ;;  %v1209_v46 = vpop.f32.mrf.mxu0  ;;  %v1316_v39 = vpop.f32.mrf.mxu1 }
 0x1d5   :  { %v1210_v32 = vadd.f32 %v1209_v46, %v3331_v61 }
 0x1d7   :  { %v3450_v14 = vpop.f32.mrf.mxu2  ;;  %v3452_v57 = vpop.f32.mrf.mxu3  ;;  %v1317_v44 = vadd.f32 %v1316_v39, %v1210_v32 }
 0x1dc   :  { %1496 = vmatmul.f32.gmra.mxu2 %v3275_v26  ;;  %1589 = vmatmul.f32.gmra.mxu3 %v3281_v37  ;;  %v1214_v26 = vpop.f32.mrf.mxu0  ;;  %v1322_v7 = vpop.f32.mrf.mxu1 }
 0x1dd   :  { %v1215_v60 = vadd.f32 %v1214_v26, %v3339_v18 }
 0x1df   :  { %v3463_v31 = vpop.f32.mrf.mxu2  ;;  %v3465_v53 = vpop.f32.mrf.mxu3  ;;  %v1323_v45 = vadd.f32 %v1322_v7, %v1215_v60 }
 0x1e4   :  { %1500 = vmatmul.f32.gmra.mxu2 %v3281_v37  ;;  %1593 = vmatmul.f32.gmra.mxu3 %v3286_v13  ;;  %v1219_v21 = vpop.f32.mrf.mxu0  ;;  %v1328_v16 = vpop.f32.mrf.mxu1 }
 0x1e5   :  { %v1220_v15 = vadd.f32 %v1219_v21, %v3356_v5 }
 0x1e7   :  { %v3477_v24 = vpop.f32.mrf.mxu2  ;;  %v3479_v22 = vpop.f32.mrf.mxu3  ;;  %v1329_v17 = vadd.f32 %v1328_v16, %v1220_v15 }
 0x1ec   :  { %1504 = vmatmul.f32.gmra.mxu2 %v3286_v13  ;;  %v1224_v52 = vpop.f32.mrf.mxu0  ;;  %v1334_v43 = vpop.f32.mrf.mxu1 }
 0x1ef   :  { %v3486_v37 = vpop.f32.mrf.mxu2  ;;  %v1534_v40 = vpop.f32.mrf.mxu3 }
 0x1f4   :  { %v1229_v9 = vpop.f32.mrf.mxu0  ;;  %v1340_v28 = vpop.f32.mrf.mxu1 }
 0x1f7   :  { %v1445_v55 = vpop.f32.mrf.mxu2  ;;  %v1538_v25 = vpop.f32.mrf.mxu3 }
 0x1f8   :  { %v1446_v38 = vadd.f32 %v1445_v55, %v1311_v41 }
 0x1fa   :  { %v1535_v0 = vadd.f32 %v1534_v40, %v1446_v38 }
 0x1fc   :  { %v1597_v13 = vmul.f32 0.2, %v1535_v0  ;;  %v1234_v7 = vpop.f32.mrf.mxu0  ;;  %v1346_v21 = vpop.f32.mrf.mxu1 }
 0x1fe   :  { %v1613_v36 = vmax.f32 %v1535_v0, %v1597_v13 }
 0x1ff   :  { %v1449_v23 = vpop.f32.mrf.mxu2  ;;  %v1542_v10 = vpop.f32.mrf.mxu3 }
 0x200   :  { %v1642_v3 = vsel %vm54_vm0, %v1613_v36, 0  ;;  %v1450_v63 = vadd.f32 %v1449_v23, %v1317_v44  ;;  %v1225_v36 = vadd.f32 %v1224_v52, %v3364_v30 }
 0x201   :  { %v3491_v29 = vand.u32 4294901760, %v1642_v3 }
 0x202   :  { %v1539_v62 = vadd.f32 %v1538_v25, %v1450_v63 }
 0x203   :  { %v1714_v50 = vsub.f32 %v1642_v3, %v3491_v29  ;;  %1899 = vmatmul.f32.vlgmr.msrb.gmra.mxu1 %v3491_v29  ;;  %v1335_v3 = vadd.f32 %v1334_v43, %v1225_v36 }
 0x204   :  { %v1598_v61 = vmul.f32 0.2, %v1539_v62  ;;  %v1352_v43 = vpop.f32.mrf.mxu1 }
 0x205   :  { %1997 = vmatmul.f32.vlgmr.msra.gmra.mxu2 %v1714_v50  ;;  %v1715_v54 = vand.u32 4294901760, %v1714_v50 }
 0x206   :  { %v1614_v58 = vmax.f32 %v1539_v62, %v1598_v61 }
 0x207   :  { %v1453_v51 = vpop.f32.mrf.mxu2  ;;  %v1546_v48 = vpop.f32.mrf.mxu3  ;;  %2103 = vmatmul.f32.vlgmr.msra.gmra.mxu3 %v1715_v54  ;;  %v1716_v49 = vsub.f32 %v1714_v50, %v1715_v54 }
 0x208   :  { %v1645_v6 = vsel %vm54_vm0, %v1614_v58, 0  ;;  %v1454_v33 = vadd.f32 %v1453_v51, %v1323_v45  ;;  %v1239_v50 = vpop.f32.mrf.mxu0  ;;  %v1230_v45 = vadd.f32 %v1229_v9, %v3381_v20 }
 0x209   :  { %v1717_v46 = vand.u32 4294901760, %v1716_v49  ;;  %v3497_v18 = vand.u32 4294901760, %v1645_v6 }
 0x20a   :  { %v1543_v4 = vadd.f32 %v1542_v10, %v1454_v33  ;;  %v1341_v33 = vadd.f32 %v1340_v28, %v1230_v45 }
 0x20b   :  { %1718 = vmatmul.f32.vlgmr.msrb.gmra.mxu0 %v1717_v46  ;;  %1903 = vmatmul.f32.gmra.mxu1 %v3497_v18  ;;  %v1722_v39 = vsub.f32 %v1645_v6, %v3497_v18 }
 0x20c   :  { %v1599_v1 = vmul.f32 0.2, %v1543_v4 }
 0x20d   :  { %2002 = vmatmul.f32.gmra.mxu2 %v1722_v39  ;;  %v1723_v26 = vand.u32 4294901760, %v1722_v39 }
 0x20e   :  { %v1615_v40 = vmax.f32 %v1543_v4, %v1599_v1 }
 0x20f   :  { %v1457_v41 = vpop.f32.mrf.mxu2  ;;  %v1550_v55 = vpop.f32.mrf.mxu3  ;;  %2109 = vmatmul.f32.gmra.mxu3 %v1723_v26  ;;  %v1724_v25 = vsub.f32 %v1722_v39, %v1723_v26 }
 0x210   :  { %v1648_v38 = vsel %vm54_vm0, %v1615_v40, 0  ;;  %v1458_v0 = vadd.f32 %v1457_v41, %v1329_v17  ;;  %v1244_v9 = vpop.f32.mrf.mxu0  ;;  %v1235_v17 = vadd.f32 %v1234_v7, %v3389_v8  ;;  %v990_v7 = vadd.f32 %v3415_v12, %v3311_v34 }
 0x211   :  { %v1725_v32 = vand.u32 4294901760, %v1724_v25  ;;  %v3503_v5 = vand.u32 4294901760, %v1648_v38  ;;  %v1358_v25 = vpop.f32.mrf.mxu1 }
 0x212   :  { %v1547_v13 = vadd.f32 %v1546_v48, %v1458_v0  ;;  %v1347_v0 = vadd.f32 %v1346_v21, %v1235_v17 }
 0x213   :  { %1726 = vmatmul.f32.gmra.mxu0 %v1725_v32  ;;  %1907 = vmatmul.f32.gmra.mxu1 %v3503_v5  ;;  %v1730_v44 = vsub.f32 %v1648_v38, %v3503_v5 }
 0x214   :  { %v1600_v16 = vmul.f32 0.2, %v1547_v13 }
 0x215   :  { %2007 = vmatmul.f32.gmra.mxu2 %v1730_v44  ;;  %v1731_v23 = vand.u32 4294901760, %v1730_v44 }
 0x216   :  { %v1616_v10 = vmax.f32 %v1547_v13, %v1600_v16 }
 0x217   :  { %v1461_v63 = vpop.f32.mrf.mxu2  ;;  %v1554_v62 = vpop.f32.mrf.mxu3  ;;  %2115 = vmatmul.f32.gmra.mxu3 %v1731_v23  ;;  %v1732_v60 = vsub.f32 %v1730_v44, %v1731_v23 }
 0x218   :  { %v1651_v61 = vsel %vm54_vm0, %v1616_v10, 0  ;;  %v1462_v54 = vadd.f32 %v1461_v63, %v1335_v3  ;;  %v1240_v3 = vadd.f32 %v1239_v50, %v3408_v2  ;;  %v1249_v63 = vpop.f32.mrf.mxu0 }
 0x219   :  { %v1733_v58 = vand.u32 4294901760, %v1732_v60  ;;  %v3509_v30 = vand.u32 4294901760, %v1651_v61  ;;  %v1364_v50 = vpop.f32.mrf.mxu1 }
 0x21a   :  { %v1551_v52 = vadd.f32 %v1550_v55, %v1462_v54 }
 0x21b   :  { %1734 = vmatmul.f32.gmra.mxu0 %v1733_v58  ;;  %1911 = vmatmul.f32.gmra.mxu1 %v3509_v30  ;;  %v1738_v51 = vsub.f32 %v1651_v61, %v3509_v30  ;;  %v1139_v61 = vadd.f32 %v3403_v11, %v990_v7  ;;  %v1353_v58 = vadd.f32 %v1352_v43, %v1240_v3 }
 0x21c   :  { %v1601_v48 = vmul.f32 0.2, %v1551_v52 }
 0x21d   :  { %2012 = vmatmul.f32.gmra.mxu2 %v1738_v51  ;;  %v1739_v49 = vand.u32 4294901760, %v1738_v51 }
 0x21e   :  { %v1617_v6 = vmax.f32 %v1551_v52, %v1601_v48 }
 0x21f   :  { %v1465_v46 = vpop.f32.mrf.mxu2  ;;  %v1558_v4 = vpop.f32.mrf.mxu3  ;;  %2121 = vmatmul.f32.gmra.mxu3 %v1739_v49  ;;  %v1740_v15 = vsub.f32 %v1738_v51, %v1739_v49 }
 0x220   :  { %v1654_v39 = vsel %vm54_vm0, %v1617_v6, 0  ;;  %v1466_v1 = vadd.f32 %v1465_v46, %v1341_v33  ;;  %v998_v6 = vadd.f32 %v3429_v47, %v3311_v34  ;;  %v1245_v46 = vadd.f32 %v1244_v9, %v1139_v61 }
 0x221   :  { %v1741_v26 = vand.u32 4294901760, %v1740_v15  ;;  %v3515_v20 = vand.u32 4294901760, %v1654_v39  ;;  %v1254_v15 = vpop.f32.mrf.mxu0  ;;  %v1014_v61 = vadd.f32 %v3444_v42, %v3311_v34 }
 0x222   :  { %v1555_v40 = vadd.f32 %v1554_v62, %v1466_v1 }
 0x223   :  { %1742 = vmatmul.f32.gmra.mxu0 %v1741_v26  ;;  %1915 = vmatmul.f32.gmra.mxu1 %v3515_v20  ;;  %v1746_v41 = vsub.f32 %v1654_v39, %v3515_v20  ;;  %v1143_v39 = vadd.f32 %v3417_v59, %v998_v6  ;;  %v1359_v26 = vadd.f32 %v1358_v25, %v1245_v46 }
 0x224   :  { %v1602_v28 = vmul.f32 0.2, %v1555_v40 }
 0x225   :  { %2017 = vmatmul.f32.gmra.mxu2 %v1746_v41  ;;  %v1747_v55 = vand.u32 4294901760, %v1746_v41 }
 0x226   :  { %v1618_v38 = vmax.f32 %v1555_v40, %v1602_v28 }
 0x227   :  { %v1469_v32 = vpop.f32.mrf.mxu2  ;;  %v1562_v13 = vpop.f32.mrf.mxu3  ;;  %2127 = vmatmul.f32.gmra.mxu3 %v1747_v55  ;;  %v1748_v36 = vsub.f32 %v1746_v41, %v1747_v55 }
 0x228   :  { %v1657_v44 = vsel %vm54_vm0, %v1618_v38, 0  ;;  %v1470_v16 = vadd.f32 %v1469_v32, %v1347_v0  ;;  %v1006_v38 = vadd.f32 %v3435_v19, %v3311_v34  ;;  %v1250_v32 = vadd.f32 %v1249_v63, %v1143_v39 }
 0x229   :  { %v1749_v23 = vand.u32 4294901760, %v1748_v36  ;;  %v3521_v8 = vand.u32 4294901760, %v1657_v44  ;;  %v1259_v63 = vpop.f32.mrf.mxu0 }
 0x22a   :  { %v1559_v10 = vadd.f32 %v1558_v4, %v1470_v16 }
 0x22b   :  { %1750 = vmatmul.f32.gmra.mxu0 %v1749_v23  ;;  %1919 = vmatmul.f32.gmra.mxu1 %v3521_v8  ;;  %v1754_v21 = vsub.f32 %v1657_v44, %v3521_v8  ;;  %v1147_v44 = vadd.f32 %v3431_v56, %v1006_v38  ;;  %v1365_v23 = vadd.f32 %v1364_v50, %v1250_v32 }
 0x22c   :  { %v1603_v62 = vmul.f32 0.2, %v1559_v10 }
 0x22d   :  { %2022 = vmatmul.f32.gmra.mxu2 %v1754_v21  ;;  %v1755_v60 = vand.u32 4294901760, %v1754_v21 }
 0x22e   :  { %v1619_v54 = vmax.f32 %v1559_v10, %v1603_v62 }
 0x22f   :  { %v1473_v52 = vpop.f32.mrf.mxu2  ;;  %v1566_v45 = vpop.f32.mrf.mxu3  ;;  %2133 = vmatmul.f32.gmra.mxu3 %v1755_v60  ;;  %v1756_v12 = vsub.f32 %v1754_v21, %v1755_v60 }
 0x230   :  { %v1660_v51 = vsel %vm54_vm0, %v1619_v54, 0  ;;  %v1474_v2 = vadd.f32 %v1473_v52, %v1353_v58  ;;  %v1255_v58 = vadd.f32 %v1254_v15, %v1147_v44 }
 0x231   :  { %v1757_v48 = vand.u32 4294901760, %v1756_v12  ;;  %v3530_v49 = vand.u32 4294901760, %v1660_v51 }
 0x232   :  { %v1563_v33 = vadd.f32 %v1562_v13, %v1474_v2  ;;  %v1370_v13 = vpop.f32.mrf.mxu1 }
 0x233   :  { %1758 = vmatmul.f32.gmra.mxu0 %v1757_v48  ;;  %1923 = vmatmul.f32.gmra.mxu1 %v3530_v49  ;;  %v1762_v11 = vsub.f32 %v1660_v51, %v3530_v49  ;;  %v1151_v51 = vadd.f32 %v3437_v27, %v1014_v61  ;;  %v1371_v50 = vadd.f32 %v1370_v13, %v1255_v58 }
 0x234   :  { %v1604_v43 = vmul.f32 0.2, %v1563_v33 }
 0x235   :  { %2027 = vmatmul.f32.gmra.mxu2 %v1762_v11  ;;  %v1763_v4 = vand.u32 4294901760, %v1762_v11  ;;  %v1260_v39 = vadd.f32 %v1259_v63, %v1151_v51 }
 0x236   :  { %v1620_v1 = vmax.f32 %v1563_v33, %v1604_v43 }
 0x237   :  { %v1477_v40 = vpop.f32.mrf.mxu2  ;;  %v1570_v17 = vpop.f32.mrf.mxu3  ;;  %2139 = vmatmul.f32.gmra.mxu3 %v1763_v4  ;;  %v1764_v41 = vsub.f32 %v1762_v11, %v1763_v4  ;;  %v1022_v4 = vadd.f32 %v3450_v14, %v3311_v34 }
 0x238   :  { %v1663_v47 = vsel %vm54_vm0, %v1620_v1, 0  ;;  %v1478_v9 = vadd.f32 %v1477_v40, %v1359_v26  ;;  %v1264_v1 = vpop.f32.mrf.mxu0 }
 0x239   :  { %v1765_v28 = vand.u32 4294901760, %v1764_v41  ;;  %v3538_v55 = vand.u32 4294901760, %v1663_v47 }
 0x23a   :  { %v1567_v0 = vadd.f32 %v1566_v45, %v1478_v9  ;;  %v1376_v45 = vpop.f32.mrf.mxu1 }
 0x23b   :  { %1766 = vmatmul.f32.gmra.mxu0 %v1765_v28  ;;  %1927 = vmatmul.f32.gmra.mxu1 %v3538_v55  ;;  %v1770_v59 = vsub.f32 %v1663_v47, %v3538_v55  ;;  %v1377_v47 = vadd.f32 %v1376_v45, %v1260_v39  ;;  %v1046_v39 = vadd.f32 %v3486_v37, %v3311_v34 }
 0x23c   :  { %v1605_v25 = vmul.f32 0.2, %v1567_v0 }
 0x23d   :  { %2032 = vmatmul.f32.gmra.mxu2 %v1770_v59  ;;  %v1771_v36 = vand.u32 4294901760, %v1770_v59 }
 0x23e   :  { %v1621_v16 = vmax.f32 %v1567_v0, %v1605_v25 }
 0x23f   :  { %v1481_v7 = vpop.f32.mrf.mxu2  ;;  %v1574_v10 = vpop.f32.mrf.mxu3  ;;  %2145 = vmatmul.f32.gmra.mxu3 %v1771_v36  ;;  %v1772_v3 = vsub.f32 %v1770_v59, %v1771_v36  ;;  %v1030_v59 = vadd.f32 %v3463_v31, %v3311_v34 }
 0x240   :  { %v1666_v19 = vsel %vm54_vm0, %v1621_v16, 0  ;;  %v1482_v21 = vadd.f32 %v1481_v7, %v1365_v23  ;;  %v1269_v23 = vpop.f32.mrf.mxu0 }
 0x241   :  { %v1773_v62 = vand.u32 4294901760, %v1772_v3  ;;  %v3546_v60 = vand.u32 4294901760, %v1666_v19 }
 0x242   :  { %v1571_v54 = vadd.f32 %v1570_v17, %v1482_v21  ;;  %v1155_v17 = vadd.f32 %v3446_v35, %v1022_v4  ;;  %v1382_v9 = vpop.f32.mrf.mxu1 }
 0x243   :  { %1774 = vmatmul.f32.gmra.mxu0 %v1773_v62  ;;  %1931 = vmatmul.f32.gmra.mxu1 %v3546_v60  ;;  %v1778_v56 = vsub.f32 %v1666_v19, %v3546_v60 }
 0x244   :  { %v1606_v52 = vmul.f32 0.2, %v1571_v54  ;;  %v1265_v36 = vadd.f32 %v1264_v1, %v1155_v17 }
 0x245   :  { %2037 = vmatmul.f32.gmra.mxu2 %v1778_v56  ;;  %v1779_v12 = vand.u32 4294901760, %v1778_v56 }
 0x246   :  { %v1622_v2 = vmax.f32 %v1571_v54, %v1606_v52  ;;  %v1383_v19 = vadd.f32 %v1382_v9, %v1265_v36 }
 0x247   :  { %v1485_v48 = vpop.f32.mrf.mxu2  ;;  %2151 = vmatmul.f32.gmra.mxu3 %v1779_v12  ;;  %v1780_v6 = vsub.f32 %v1778_v56, %v1779_v12  ;;  %v1578_v46 = vpop.f32.mrf.mxu3  ;;  %v1038_v56 = vadd.f32 %v3477_v24, %v3311_v34 }
 0x248   :  { %v1669_v42 = vsel %vm54_vm0, %v1622_v2, 0  ;;  %v1486_v33 = vadd.f32 %v1485_v48, %v1371_v50 }
 0x249   :  { %v1781_v11 = vand.u32 4294901760, %v1780_v6  ;;  %v3554_v43 = vand.u32 4294901760, %v1669_v42  ;;  %v1163_v50 = vadd.f32 %v3465_v53, %v1038_v56 }
 0x24a   :  { %v1575_v15 = vadd.f32 %v1574_v10, %v1486_v33  ;;  %v1159_v10 = vadd.f32 %v3452_v57, %v1030_v59  ;;  %v1388_v61 = vpop.f32.mrf.mxu1 }
 0x24b   :  { %1782 = vmatmul.f32.gmra.mxu0 %v1781_v11  ;;  %1935 = vmatmul.f32.gmra.mxu1 %v3554_v43  ;;  %v1786_v27 = vsub.f32 %v1669_v42, %v3554_v43  ;;  %v1274_v42 = vpop.f32.mrf.mxu0 }
 0x24c   :  { %v1607_v26 = vmul.f32 0.2, %v1575_v15  ;;  %v1270_v45 = vadd.f32 %v1269_v23, %v1159_v10 }
 0x24d   :  { %2042 = vmatmul.f32.gmra.mxu2 %v1786_v27  ;;  %v1787_v40 = vand.u32 4294901760, %v1786_v27 }
 0x24e   :  { %v1623_v41 = vmax.f32 %v1575_v15, %v1607_v26  ;;  %v1389_v6 = vadd.f32 %v1388_v61, %v1270_v45 }
 0x24f   :  { %v1489_v28 = vpop.f32.mrf.mxu2  ;;  %2157 = vmatmul.f32.gmra.mxu3 %v1787_v40  ;;  %v1788_v38 = vsub.f32 %v1786_v27, %v1787_v40  ;;  %v1582_v44 = vpop.f32.mrf.mxu3  ;;  %v1275_v27 = vadd.f32 %v1274_v42, %v1163_v50 }
 0x250   :  { %v1672_v14 = vsel %vm54_vm0, %v1623_v41, 0  ;;  %v1490_v0 = vadd.f32 %v1489_v28, %v1377_v47  ;;  %v1167_v41 = vadd.f32 %v3479_v22, %v1046_v39 }
 0x251   :  { %v1789_v32 = vand.u32 4294901760, %v1788_v38  ;;  %v3562_v13 = vand.u32 4294901760, %v1672_v14 }
 0x252   :  { %v1579_v25 = vadd.f32 %v1578_v46, %v1490_v0  ;;  %v1394_v26 = vpop.f32.mrf.mxu1 }
 0x253   :  { %1790 = vmatmul.f32.gmra.mxu0 %v1789_v32  ;;  %1939 = vmatmul.f32.gmra.mxu1 %v3562_v13  ;;  %v1794_v35 = vsub.f32 %v1672_v14, %v3562_v13  ;;  %v1395_v9 = vadd.f32 %v1394_v26, %v1275_v27  ;;  %v1279_v0 = vpop.f32.mrf.mxu0 }
 0x254   :  { %v1608_v16 = vmul.f32 0.2, %v1579_v25  ;;  %v1280_v36 = vadd.f32 %v1279_v0, %v1167_v41 }
 0x255   :  { %2047 = vmatmul.f32.gmra.mxu2 %v1794_v35  ;;  %v1795_v7 = vand.u32 4294901760, %v1794_v35 }
 0x256   :  { %v1624_v3 = vmax.f32 %v1579_v25, %v1608_v16 }
 0x257   :  { %v1493_v21 = vpop.f32.mrf.mxu2  ;;  %2163 = vmatmul.f32.gmra.mxu3 %v1795_v7  ;;  %v1796_v63 = vsub.f32 %v1794_v35, %v1795_v7  ;;  %v1586_v51 = vpop.f32.mrf.mxu3 }
 0x258   :  { %v1675_v31 = vsel %vm54_vm0, %v1624_v3, 0  ;;  %v1494_v62 = vadd.f32 %v1493_v21, %v1383_v19 }
 0x259   :  { %v1797_v54 = vand.u32 4294901760, %v1796_v63  ;;  %v3570_v58 = vand.u32 4294901760, %v1675_v31 }
 0x25a   :  { %v1583_v52 = vadd.f32 %v1582_v44, %v1494_v62  ;;  %v1400_v35 = vpop.f32.mrf.mxu1 }
 0x25b   :  { %1798 = vmatmul.f32.gmra.mxu0 %v1797_v54  ;;  %1943 = vmatmul.f32.gmra.mxu1 %v3570_v58  ;;  %v1802_v57 = vsub.f32 %v1675_v31, %v3570_v58  ;;  %v1401_v7 = vadd.f32 %v1400_v35, %v1280_v36 }
 0x25c   :  { %v1609_v12 = vmul.f32 0.2, %v1583_v52 }
 0x25d   :  { %2052 = vmatmul.f32.gmra.mxu2 %v1802_v57  ;;  %v1803_v2 = vand.u32 4294901760, %v1802_v57 }
 0x25e   :  { %v1625_v48 = vmax.f32 %v1583_v52, %v1609_v12 }
 0x25f   :  { %v1497_v33 = vpop.f32.mrf.mxu2  ;;  %2169 = vmatmul.f32.gmra.mxu3 %v1803_v2  ;;  %v1804_v46 = vsub.f32 %v1802_v57, %v1803_v2  ;;  %v1590_v28 = vpop.f32.mrf.mxu3 }
 0x260   :  { %v1678_v24 = vsel %vm54_vm0, %v1625_v48, 0  ;;  %v1498_v11 = vadd.f32 %v1497_v33, %v1389_v6 }
 0x261   :  { %v1805_v4 = vand.u32 4294901760, %v1804_v46  ;;  %v3578_v15 = vand.u32 4294901760, %v1678_v24 }
 0x262   :  { %v1587_v1 = vadd.f32 %v1586_v51, %v1498_v11 }
 0x263   :  { %1806 = vmatmul.f32.gmra.mxu0 %v1805_v4  ;;  %1947 = vmatmul.f32.gmra.mxu1 %v3578_v15  ;;  %v1810_v53 = vsub.f32 %v1678_v24, %v3578_v15 }
 0x264   :  { %v1610_v40 = vmul.f32 0.2, %v1587_v1 }
 0x265   :  { %2057 = vmatmul.f32.gmra.mxu2 %v1810_v53  ;;  %v1811_v17 = vand.u32 4294901760, %v1810_v53 }
 0x266   :  { %v1626_v47 = vmax.f32 %v1587_v1, %v1610_v40 }
 0x267   :  { %v1501_v38 = vpop.f32.mrf.mxu2  ;;  %2175 = vmatmul.f32.gmra.mxu3 %v1811_v17  ;;  %v1812_v14 = vsub.f32 %v1810_v53, %v1811_v17  ;;  %v1594_v63 = vpop.f32.mrf.mxu3 }
 0x268   :  { %v1681_v34 = vsel %vm54_vm0, %v1626_v47, 0  ;;  %v1502_v37 = vadd.f32 %v1501_v38, %v1395_v9 }
 0x269   :  { %v1813_v32 = vand.u32 4294901760, %v1812_v14  ;;  %v3586_v59 = vand.u32 4294901760, %v1681_v34 }
 0x26a   :  { %v1591_v25 = vadd.f32 %v1590_v28, %v1502_v37 }
 0x26b   :  { %1814 = vmatmul.f32.gmra.mxu0 %v1813_v32  ;;  %1951 = vmatmul.f32.gmra.mxu1 %v3586_v59  ;;  %v1818_v22 = vsub.f32 %v1681_v34, %v3586_v59 }
 0x26c   :  { %v1611_v44 = vmul.f32 0.2, %v1591_v25 }
 0x26d   :  { %2062 = vmatmul.f32.gmra.mxu2 %v1818_v22  ;;  %v1819_v16 = vand.u32 4294901760, %v1818_v22 }
 0x26e   :  { %v1627_v23 = vmax.f32 %v1591_v25, %v1611_v44 }
 0x26f   :  { %v1505_v10 = vpop.f32.mrf.mxu2  ;;  %2181 = vmatmul.f32.gmra.mxu3 %v1819_v16  ;;  %v1820_v3 = vsub.f32 %v1818_v22, %v1819_v16 }
 0x270   :  { %v1684_v19 = vsel %vm54_vm0, %v1627_v23, 0  ;;  %v1506_v21 = vadd.f32 %v1505_v10, %v1401_v7 }
 0x271   :  { %v1821_v31 = vand.u32 4294901760, %v1820_v3  ;;  %v3591_v62 = vand.u32 4294901760, %v1684_v19 }
 0x272   :  { %v1595_v61 = vadd.f32 %v1594_v63, %v1506_v21 }
 0x273   :  { %1822 = vmatmul.f32.gmra.mxu0 %v1821_v31  ;;  %1955 = vmatmul.f32.gmra.mxu1 %v3591_v62  ;;  %v1826_v54 = vsub.f32 %v1684_v19, %v3591_v62 }
 0x274   :  { %v1612_v56 = vmul.f32 0.2, %v1595_v61 }
 0x275   :  { %2067 = vmatmul.f32.gmra.mxu2 %v1826_v54  ;;  %v1827_v52 = vand.u32 4294901760, %v1826_v54 }
 0x276   :  { %v1628_v45 = vmax.f32 %v1595_v61, %v1612_v56 }
 0x277   :  { %2187 = vmatmul.f32.gmra.mxu3 %v1827_v52  ;;  %v1828_v57 = vsub.f32 %v1826_v54, %v1827_v52 }
 0x278   :  { %v1687_v12 = vsel %vm54_vm0, %v1628_v45, 0 }
 0x279   :  { %v1829_v51 = vand.u32 4294901760, %v1828_v57  ;;  %v3596_v2 = vand.u32 4294901760, %v1687_v12 }
 0x27b   :  { %1830 = vmatmul.f32.gmra.mxu0 %v1829_v51  ;;  %1959 = vmatmul.f32.gmra.mxu1 %v3596_v2  ;;  %v1834_v50 = vsub.f32 %v1687_v12, %v3596_v2 }
 0x27d   :  { %2072 = vmatmul.f32.gmra.mxu2 %v1834_v50  ;;  %v1835_v48 = vand.u32 4294901760, %v1834_v50 }
 0x27f   :  { %2193 = vmatmul.f32.gmra.mxu3 %v1835_v48  ;;  %v1836_v6 = vsub.f32 %v1834_v50, %v1835_v48 }
 0x280   :  { %v3600_v42 = vpop.f32.mrf.mxu1 }
 0x281   :  { %v1837_v33 = vand.u32 4294901760, %v1836_v6 }
 0x283   :  { %1838 = vmatmul.f32.gmra.mxu0 %v1837_v33  ;;  %2327 = vmatmul.f32.vlgmr.msra.gmra.mxu1 %v3491_v29 }
 0x288   :  { %v3603_v46 = vpop.f32.mrf.mxu0  ;;  %v3605_v24 = vpop.f32.mrf.mxu1 }
 0x289   :  { %v1998_v22 = vpop.f32.mrf.mxu2 }
 0x28b   :  { %2238 = vmatmul.f32.vlgmr.msra.gmra.mxu0 %v3491_v29  ;;  %2331 = vmatmul.f32.gmra.mxu1 %v3497_v18 }
 0x290   :  { %v3609_v11 = vpop.f32.mrf.mxu0  ;;  %v3611_v4 = vpop.f32.mrf.mxu1 }
 0x293   :  { %2242 = vmatmul.f32.gmra.mxu0 %v3497_v18  ;;  %2335 = vmatmul.f32.gmra.mxu1 %v3503_v5 }
 0x298   :  { %v3615_v39 = vpop.f32.mrf.mxu0  ;;  %v3617_v1 = vpop.f32.mrf.mxu1 }
 0x29b   :  { %2246 = vmatmul.f32.gmra.mxu0 %v3503_v5  ;;  %2339 = vmatmul.f32.gmra.mxu1 %v3509_v30 }
 0x2a0   :  { %v3621_v27 = vpop.f32.mrf.mxu0  ;;  %v3623_v29 = vpop.f32.mrf.mxu1 }
 0x2a3   :  { %2250 = vmatmul.f32.gmra.mxu0 %v3509_v30  ;;  %2343 = vmatmul.f32.gmra.mxu1 %v3515_v20 }
 0x2a8   :  { %v3627_v26 = vpop.f32.mrf.mxu0  ;;  %v3629_v18 = vpop.f32.mrf.mxu1 }
 0x2ab   :  { %2254 = vmatmul.f32.gmra.mxu0 %v3515_v20  ;;  %2347 = vmatmul.f32.gmra.mxu1 %v3521_v8 }
 0x2b0   :  { %v3633_v53 = vpop.f32.mrf.mxu0  ;;  %v3635_v5 = vpop.f32.mrf.mxu1 }
 0x2b3   :  { %2258 = vmatmul.f32.gmra.mxu0 %v3521_v8  ;;  %2351 = vmatmul.f32.gmra.mxu1 %v3530_v49  ;;  %v3652_v8 = vld [vmem:[%s3795_s6] ss:$0 sm:$0xff] }
 0x2b4   :  { %v1728_v48 = vadd.f32 %v3652_v8, %v3609_v11 }
 0x2b8   :  { %v3639_v40 = vpop.f32.mrf.mxu0  ;;  %v3641_v30 = vpop.f32.mrf.mxu1 }
 0x2bb   :  { %2262 = vmatmul.f32.gmra.mxu0 %v3530_v49  ;;  %2355 = vmatmul.f32.gmra.mxu1 %v3538_v55 }
 0x2c0   :  { %v3645_v17 = vpop.f32.mrf.mxu0  ;;  %v1932_v20 = vpop.f32.mrf.mxu1 }
 0x2c3   :  { %2266 = vmatmul.f32.gmra.mxu0 %v3538_v55  ;;  %2359 = vmatmul.f32.gmra.mxu1 %v3546_v60 }
 0x2c8   :  { %v1783_v41 = vpop.f32.mrf.mxu0  ;;  %v1936_v47 = vpop.f32.mrf.mxu1 }
 0x2c9   :  { %v1784_v9 = vadd.f32 %v3652_v8, %v1783_v41 }
 0x2cb   :  { %v3655_v28 = vadd.f32 %v1932_v20, %v1784_v9  ;;  %2270 = vmatmul.f32.gmra.mxu0 %v3546_v60  ;;  %2363 = vmatmul.f32.gmra.mxu1 %v3554_v43  ;;  %v1736_v9 = vadd.f32 %v3652_v8, %v3615_v39 }
 0x2cd   :  { %v1909_v11 = vadd.f32 %v3611_v4, %v1736_v9 }
 0x2d0   :  { %v1791_v49 = vpop.f32.mrf.mxu0  ;;  %v1940_v38 = vpop.f32.mrf.mxu1 }
 0x2d1   :  { %v1792_v55 = vadd.f32 %v3652_v8, %v1791_v49 }
 0x2d3   :  { %v3660_v14 = vadd.f32 %v1936_v47, %v1792_v55  ;;  %2274 = vmatmul.f32.gmra.mxu0 %v3554_v43  ;;  %2367 = vmatmul.f32.gmra.mxu1 %v3562_v13  ;;  %v2104_v43 = vpop.f32.mrf.mxu3 }
 0x2d8   :  { %v1799_v34 = vpop.f32.mrf.mxu0  ;;  %v1944_v37 = vpop.f32.mrf.mxu1 }
 0x2d9   :  { %v1800_v0 = vadd.f32 %v3652_v8, %v1799_v34 }
 0x2db   :  { %v3665_v32 = vadd.f32 %v1940_v38, %v1800_v0  ;;  %2278 = vmatmul.f32.gmra.mxu0 %v3562_v13  ;;  %2371 = vmatmul.f32.gmra.mxu1 %v3570_v58  ;;  %v2003_v13 = vpop.f32.mrf.mxu2  ;;  %v2110_v19 = vpop.f32.mrf.mxu3 }
 0x2e0   :  { %v1807_v60 = vpop.f32.mrf.mxu0  ;;  %v1948_v25 = vpop.f32.mrf.mxu1 }
 0x2e1   :  { %v1808_v36 = vadd.f32 %v3652_v8, %v1807_v60 }
 0x2e3   :  { %v3670_v44 = vadd.f32 %v1944_v37, %v1808_v36  ;;  %2282 = vmatmul.f32.gmra.mxu0 %v3570_v58  ;;  %2375 = vmatmul.f32.gmra.mxu1 %v3578_v15  ;;  %v2008_v63 = vpop.f32.mrf.mxu2  ;;  %v2116_v56 = vpop.f32.mrf.mxu3 }
 0x2e8   :  { %v1815_v35 = vpop.f32.mrf.mxu0  ;;  %v1952_v16 = vpop.f32.mrf.mxu1 }
 0x2e9   :  { %v1816_v23 = vadd.f32 %v3652_v8, %v1815_v35 }
 0x2eb   :  { %v3675_v7 = vadd.f32 %v1948_v25, %v1816_v23  ;;  %2286 = vmatmul.f32.gmra.mxu0 %v3578_v15  ;;  %2379 = vmatmul.f32.gmra.mxu1 %v3586_v59  ;;  %v1720_v15 = vadd.f32 %v3652_v8, %v3603_v46  ;;  %v2013_v12 = vpop.f32.mrf.mxu2  ;;  %v2122_v33 = vpop.f32.mrf.mxu3  ;;  %v1744_v25 = vadd.f32 %v3652_v8, %v3621_v27 }
 0x2ec   :  { %v1752_v27 = vadd.f32 %v3652_v8, %v3627_v26 }
 0x2ed   :  { %v1901_v45 = vadd.f32 %v3600_v42, %v1720_v15  ;;  %v1913_v4 = vadd.f32 %v3617_v1, %v1744_v25 }
 0x2ef   :  { %v1999_v50 = vadd.f32 %v1998_v22, %v1901_v45 }
 0x2f0   :  { %v1823_v10 = vpop.f32.mrf.mxu0  ;;  %v1956_v3 = vpop.f32.mrf.mxu1 }
 0x2f1   :  { %v1824_v21 = vadd.f32 %v3652_v8, %v1823_v10  ;;  %v2105_v46 = vadd.f32 %v2104_v43, %v1999_v50  ;;  %v2014_v10 = vadd.f32 %v2013_v12, %v1913_v4 }
 0x2f3   :  { %v3680_v58 = vadd.f32 %v1952_v16, %v1824_v21  ;;  %2290 = vmatmul.f32.gmra.mxu0 %v3586_v59  ;;  %2383 = vmatmul.f32.gmra.mxu1 %v3591_v62  ;;  %v2018_v49 = vpop.f32.mrf.mxu2  ;;  %v2128_v34 = vpop.f32.mrf.mxu3  ;;  %v1917_v21 = vadd.f32 %v3623_v29, %v1752_v27 }
 0x2f5   :  { %v2019_v15 = vadd.f32 %v2018_v49, %v1917_v21 }
 0x2f8   :  { %v1831_v31 = vpop.f32.mrf.mxu0  ;;  %v1960_v61 = vpop.f32.mrf.mxu1 }
 0x2f9   :  { %v1832_v54 = vadd.f32 %v3652_v8, %v1831_v31 }
 0x2fb   :  { %v3687_v52 = vadd.f32 %v1956_v3, %v1832_v54  ;;  %2294 = vmatmul.f32.gmra.mxu0 %v3591_v62  ;;  %2387 = vmatmul.f32.gmra.mxu1 %v3596_v2  ;;  %v1905_v62 = vadd.f32 %v3605_v24, %v1728_v48  ;;  %v2009_v24 = vadd.f32 %v2008_v63, %v1909_v11  ;;  %v2023_v39 = vpop.f32.mrf.mxu2  ;;  %v2134_v16 = vpop.f32.mrf.mxu3 }
 0x2fd   :  { %v2004_v47 = vadd.f32 %v2003_v13, %v1905_v62  ;;  %v2117_v22 = vadd.f32 %v2116_v56, %v2009_v24  ;;  %v1760_v56 = vadd.f32 %v3652_v8, %v3633_v53  ;;  %v1768_v53 = vadd.f32 %v3652_v8, %v3639_v40 }
 0x2ff   :  { %v2111_v55 = vadd.f32 %v2110_v19, %v2004_v47  ;;  %v2123_v19 = vadd.f32 %v2122_v33, %v2014_v10  ;;  %v1921_v29 = vadd.f32 %v3629_v18, %v1760_v56  ;;  %v1925_v18 = vadd.f32 %v3635_v5, %v1768_v53 }
 0x300   :  { %v1839_v59 = vpop.f32.mrf.mxu0  ;;  %v2328_v57 = vpop.f32.mrf.mxu1 }
 0x301   :  { %v1840_v51 = vadd.f32 %v3652_v8, %v1839_v59  ;;  %v2129_v59 = vadd.f32 %v2128_v34, %v2019_v15  ;;  %v2024_v33 = vadd.f32 %v2023_v39, %v1921_v29 }
 0x303   :  { %v3695_v6 = vadd.f32 %v1960_v61, %v1840_v51  ;;  %2298 = vmatmul.f32.gmra.mxu0 %v3596_v2  ;;  %v2028_v1 = vpop.f32.mrf.mxu2  ;;  %v2140_v26 = vpop.f32.mrf.mxu3 }
 0x304   :  { %v2029_v49 = vadd.f32 %v2028_v1, %v1925_v18 }
 0x306   :  { %v2141_v11 = vadd.f32 %v2140_v26, %v2029_v49 }
 0x308   :  { %v2239_v20 = vpop.f32.mrf.mxu0  ;;  %v2332_v41 = vpop.f32.mrf.mxu1 }
 0x309   :  { %v2240_v42 = vadd.f32 %v2239_v20, %v2105_v46  ;;  %v2135_v20 = vadd.f32 %v2134_v16, %v2024_v33 }
 0x30b   :  { %v2329_v38 = vadd.f32 %v2328_v57, %v2240_v42  ;;  %v2033_v51 = vpop.f32.mrf.mxu2  ;;  %v2146_v62 = vpop.f32.mrf.mxu3 }
 0x30d   :  { %2445 = vtanh.f32 %v2329_v38  ;;  %v1776_v38 = vadd.f32 %v3652_v8, %v3645_v17 }
 0x30f   :  { %v1929_v34 = vadd.f32 %v3641_v30, %v1776_v38 }
 0x310   :  { %v2243_v37 = vpop.f32.mrf.mxu0  ;;  %v2336_v2 = vpop.f32.mrf.mxu1 }
 0x311   :  { %v2244_v0 = vadd.f32 %v2243_v37, %v2111_v55  ;;  %v2034_v24 = vadd.f32 %v2033_v51, %v1929_v34 }
 0x313   :  { %v2446_v60 = vpop.eup %2445  ;;  %v2333_v36 = vadd.f32 %v2332_v41, %v2244_v0  ;;  %v2038_v40 = vpop.f32.mrf.mxu2  ;;  %v2147_v8 = vadd.f32 %v2146_v62, %v2034_v24 }
 0x314   :  { %2408 = vst.msk [vmem:[%s3796_s7] sm:$0xff] %vm2407_vm1, %v2446_v60  ;;  %v2152_v5 = vpop.f32.mrf.mxu3 }
 0x315   :  { %2447 = vtanh.f32 %v2333_v36 }
 0x318   :  { %v2247_v43 = vpop.f32.mrf.mxu0  ;;  %v2340_v35 = vpop.f32.mrf.mxu1 }
 0x319   :  { %v2248_v23 = vadd.f32 %v2247_v43, %v2117_v22  ;;  %v2039_v43 = vadd.f32 %v2038_v40, %v3655_v28 }
 0x31b   :  { %v2448_v13 = vpop.eup %2447  ;;  %v2337_v3 = vadd.f32 %v2336_v2, %v2248_v23  ;;  %v2043_v17 = vpop.f32.mrf.mxu2  ;;  %v2153_v16 = vadd.f32 %v2152_v5, %v2039_v43 }
 0x31c   :  { %2409 = vst.msk [vmem:[%s3796_s7 + $0x8] sm:$0xff] %vm2407_vm1, %v2448_v13  ;;  %v2158_v4 = vpop.f32.mrf.mxu3 }
 0x31d   :  { %2449 = vtanh.f32 %v2337_v3 }
 0x320   :  { %v2251_v63 = vpop.f32.mrf.mxu0  ;;  %v2344_v31 = vpop.f32.mrf.mxu1 }
 0x321   :  { %v2252_v61 = vadd.f32 %v2251_v63, %v2123_v19  ;;  %v2044_v19 = vadd.f32 %v2043_v17, %v3660_v14 }
 0x323   :  { %v2450_v54 = vpop.eup %2449  ;;  %v2341_v45 = vadd.f32 %v2340_v35, %v2252_v61  ;;  %v2048_v23 = vpop.f32.mrf.mxu2  ;;  %v2159_v28 = vadd.f32 %v2158_v4, %v2044_v19 }
 0x324   :  { %2410 = vst.msk [vmem:[%s3796_s7 + $0x10] sm:$0xff] %vm2407_vm1, %v2450_v54  ;;  %v2164_v1 = vpop.f32.mrf.mxu3  ;;  %v2049_v56 = vadd.f32 %v2048_v23, %v3665_v32 }
 0x325   :  { %2451 = vtanh.f32 %v2341_v45 }
 0x326   :  { %v2165_v45 = vadd.f32 %v2164_v1, %v2049_v56 }
 0x328   :  { %v2255_v57 = vpop.f32.mrf.mxu0  ;;  %v2348_v12 = vpop.f32.mrf.mxu1 }
 0x329   :  { %v2256_v50 = vadd.f32 %v2255_v57, %v2129_v59 }
 0x32b   :  { %v2452_v48 = vpop.eup %2451  ;;  %v2345_v46 = vadd.f32 %v2344_v31, %v2256_v50  ;;  %v2053_v54 = vpop.f32.mrf.mxu2 }
 0x32c   :  { %2411 = vst.msk [vmem:[%s3796_s7 + $0x18] sm:$0xff] %vm2407_vm1, %v2452_v48  ;;  %v2170_v14 = vpop.f32.mrf.mxu3  ;;  %v2054_v51 = vadd.f32 %v2053_v54, %v3670_v44 }
 0x32d   :  { %2453 = vtanh.f32 %v2345_v46 }
 0x32e   :  { %v2171_v32 = vadd.f32 %v2170_v14, %v2054_v51 }
 0x330   :  { %v2259_v41 = vpop.f32.mrf.mxu0  ;;  %v2352_v42 = vpop.f32.mrf.mxu1 }
 0x331   :  { %v2260_v47 = vadd.f32 %v2259_v41, %v2135_v20 }
 0x333   :  { %v2454_v9 = vpop.eup %2453  ;;  %v2349_v55 = vadd.f32 %v2348_v12, %v2260_v47  ;;  %v2058_v48 = vpop.f32.mrf.mxu2 }
 0x334   :  { %2412 = vst.msk [vmem:[%s3796_s7 + $0x20] sm:$0xff] %vm2407_vm1, %v2454_v9  ;;  %v2176_v33 = vpop.f32.mrf.mxu3  ;;  %v2059_v20 = vadd.f32 %v2058_v48, %v3675_v7 }
 0x335   :  { %2455 = vtanh.f32 %v2349_v55 }
 0x338   :  { %v2263_v37 = vpop.f32.mrf.mxu0  ;;  %v2356_v2 = vpop.f32.mrf.mxu1 }
 0x339   :  { %v2264_v0 = vadd.f32 %v2263_v37, %v2141_v11 }
 0x33b   :  { %v2456_v60 = vpop.eup %2455  ;;  %v2353_v25 = vadd.f32 %v2352_v42, %v2264_v0  ;;  %v2063_v41 = vpop.f32.mrf.mxu2  ;;  %v2177_v42 = vadd.f32 %v2176_v33, %v2059_v20 }
 0x33c   :  { %2413 = vst.msk [vmem:[%s3796_s7 + $0x28] sm:$0xff] %vm2407_vm1, %v2456_v60  ;;  %v2182_v49 = vpop.f32.mrf.mxu3  ;;  %v2064_v40 = vadd.f32 %v2063_v41, %v3680_v58 }
 0x33d   :  { %2457 = vtanh.f32 %v2353_v25 }
 0x33e   :  { %v2183_v11 = vadd.f32 %v2182_v49, %v2064_v40 }
 0x340   :  { %v2267_v36 = vpop.f32.mrf.mxu0  ;;  %v2360_v39 = vpop.f32.mrf.mxu1 }
 0x341   :  { %v2268_v22 = vadd.f32 %v2267_v36, %v2147_v8 }
 0x343   :  { %v2458_v30 = vpop.eup %2457  ;;  %v2357_v35 = vadd.f32 %v2356_v2, %v2268_v22  ;;  %v2068_v34 = vpop.f32.mrf.mxu2 }
 0x344   :  { %2414 = vst.msk [vmem:[%s3796_s7 + $0x30] sm:$0xff] %vm2407_vm1, %v2458_v30  ;;  %v2069_v0 = vadd.f32 %v2068_v34, %v3687_v52  ;;  %v2188_v24 = vpop.f32.mrf.mxu3 }
 0x345   :  { %2459 = vtanh.f32 %v2357_v35 }
 0x346   :  { %v2189_v58 = vadd.f32 %v2188_v24, %v2069_v0 }
 0x348   :  { %v2271_v13 = vpop.f32.mrf.mxu0  ;;  %v2364_v10 = vpop.f32.mrf.mxu1 }
 0x349   :  { %v2272_v27 = vadd.f32 %v2271_v13, %v2153_v16 }
 0x34b   :  { %v2460_v3 = vpop.eup %2459  ;;  %v2361_v21 = vadd.f32 %v2360_v39, %v2272_v27  ;;  %v2073_v36 = vpop.f32.mrf.mxu2 }
 0x34c   :  { %2415 = vst.msk [vmem:[%s3796_s7 + $0x38] sm:$0xff] %vm2407_vm1, %v2460_v3  ;;  %v2074_v22 = vadd.f32 %v2073_v36, %v3695_v6  ;;  %v2194_v52 = vpop.f32.mrf.mxu3 }
 0x34d   :  { %2461 = vtanh.f32 %v2361_v21 }
 0x34e   :  { %v2195_v30 = vadd.f32 %v2194_v52, %v2074_v22 }
 0x350   :  { %v2275_v63 = vpop.f32.mrf.mxu0  ;;  %v2368_v31 = vpop.f32.mrf.mxu1 }
 0x351   :  { %v2276_v61 = vadd.f32 %v2275_v63, %v2159_v28 }
 0x353   :  { %v2462_v15 = vpop.eup %2461  ;;  %v2365_v26 = vadd.f32 %v2364_v10, %v2276_v61 }
 0x354   :  { %2416 = vst.msk [vmem:[%s3796_s7 + $0x40] sm:$0xff] %vm2407_vm1, %v2462_v15 }
 0x355   :  { %2463 = vtanh.f32 %v2365_v26 }
 0x358   :  { %v2279_v59 = vpop.f32.mrf.mxu0  ;;  %v2372_v57 = vpop.f32.mrf.mxu1 }
 0x359   :  { %v2280_v29 = vadd.f32 %v2279_v59, %v2165_v45 }
 0x35b   :  { %v2464_v12 = vpop.eup %2463  ;;  %v2369_v50 = vadd.f32 %v2368_v31, %v2280_v29 }
 0x35c   :  { %2417 = vst.msk [vmem:[%s3796_s7 + $0x48] sm:$0xff] %vm2407_vm1, %v2464_v12 }
 0x35d   :  { %2465 = vtanh.f32 %v2369_v50 }
 0x360   :  { %v2283_v53 = vpop.f32.mrf.mxu0  ;;  %v2376_v44 = vpop.f32.mrf.mxu1 }
 0x361   :  { %v2284_v46 = vadd.f32 %v2283_v53, %v2171_v32 }
 0x363   :  { %v2466_v62 = vpop.eup %2465  ;;  %v2373_v18 = vadd.f32 %v2372_v57, %v2284_v46 }
 0x364   :  { %2418 = vst.msk [vmem:[%s3796_s7 + $0x50] sm:$0xff] %vm2407_vm1, %v2466_v62 }
 0x365   :  { %2467 = vtanh.f32 %v2373_v18 }
 0x368   :  { %v2287_v47 = vpop.f32.mrf.mxu0  ;;  %v2380_v7 = vpop.f32.mrf.mxu1 }
 0x369   :  { %v2288_v9 = vadd.f32 %v2287_v47, %v2177_v42 }
 0x36b   :  { %v2468_v38 = vpop.eup %2467  ;;  %v2377_v55 = vadd.f32 %v2376_v44, %v2288_v9 }
 0x36c   :  { %2419 = vst.msk [vmem:[%s3796_s7 + $0x58] sm:$0xff] %vm2407_vm1, %v2468_v38 }
 0x36d   :  { %2469 = vtanh.f32 %v2377_v55 }
 0x370   :  { %v2291_v5 = vpop.f32.mrf.mxu0  ;;  %v2384_v25 = vpop.f32.mrf.mxu1 }
 0x371   :  { %v2292_v37 = vadd.f32 %v2291_v5, %v2183_v11 }
 0x373   :  { %v2470_v2 = vpop.eup %2469  ;;  %v2381_v60 = vadd.f32 %v2380_v7, %v2292_v37 }
 0x374   :  { %2420 = vst.msk [vmem:[%s3796_s7 + $0x60] sm:$0xff] %vm2407_vm1, %v2470_v2 }
 0x375   :  { %2471 = vtanh.f32 %v2381_v60 }
 0x378   :  { %v2295_v17 = vpop.f32.mrf.mxu0  ;;  %v2388_v16 = vpop.f32.mrf.mxu1 }
 0x379   :  { %v2296_v8 = vadd.f32 %v2295_v17, %v2189_v58 }
 0x37b   :  { %v2472_v39 = vpop.eup %2471  ;;  %v2385_v4 = vadd.f32 %v2384_v25, %v2296_v8 }
 0x37c   :  { %2421 = vst.msk [vmem:[%s3796_s7 + $0x68] sm:$0xff] %vm2407_vm1, %v2472_v39 }
 0x37d   :  { %2473 = vtanh.f32 %v2385_v4 }
 0x380   :  { %v2299_v43 = vpop.f32.mrf.mxu0 }
 0x381   :  { %v2300_v35 = vadd.f32 %v2299_v43, %v2195_v30 }
 0x383   :  { %v2474_v23 = vpop.eup %2473  ;;  %v2389_v13 = vadd.f32 %v2388_v16, %v2300_v35 }
 0x384   :  { %2422 = vst.msk [vmem:[%s3796_s7 + $0x70] sm:$0xff] %vm2407_vm1, %v2474_v23 }
 0x385   :  { %2475 = vtanh.f32 %v2389_v13 }
 0x38b   :  { %v2476_v6 = vpop.eup %2475 }
 0x38c   :  { %2423 = vst.msk [vmem:[%s3796_s7 + $0x78] sm:$0xff] %vm2407_vm1, %v2476_v6 }

</bundles_post_ra>
